<compile_context>
chip_gen: v7x
topology: tpu7x:2x2x1
jax: 0.10.0
libtpu: 0.0.40
codegen_flags: <defaults>
</compile_context>

<pallas_src>
import numpy as np
import jax
import jax.numpy as jnp
from jax import lax
from jax.experimental import pallas as pl
from jax.experimental.pallas import tpu as pltpu


def _lstm_cell(x_gates, h, c, whh, H):
    """One LSTM step. x_gates = (precomputed) input projection + bias, shape (B, 4H)."""
    # Recurrent dot adds into the hoisted input projection (maps onto MRB in-place
    # accumulate on v7x).  Cast h to the weight dtype so a bf16 whh gives a
    # single-pass bf16 MXU matmul with f32 accumulation (no-op when whh is f32).
    gates = x_gates + jnp.dot(h.astype(whh.dtype), whh,
                              preferred_element_type=jnp.float32)
    # One full-vreg sigmoid and one full-vreg tanh over (B, 4H); slice gates after.
    sig = jax.nn.sigmoid(gates)
    tnh = jnp.tanh(gates)
    i = sig[:, 0:H]
    f = sig[:, H:2 * H]
    g = tnh[:, 2 * H:3 * H]
    o = sig[:, 3 * H:4 * H]
    c_new = f * c + i * g
    h_new = o * jnp.tanh(c_new)
    return h_new, c_new


def multistep_kernel(inp_ref,       # (T_in, TB, D_in)  time-major batch tile
                     covar_ref,     # (TB, C)
                     wih1_in_ref,   # (D_in, 4*H1)
                     wih1_cv_ref,   # (C,    4*H1)
                     whh1_ref,      # (H1,   4*H1)   (f32 or bf16)
                     b1_ref,        # (1,    4*H1)
                     wih2_h_ref,    # (H1,   4*H2)
                     wih2_c_ref,    # (C,    4*H2)
                     whh2_ref,      # (H2,   4*H2)   (f32 or bf16)
                     b2_ref,        # (1,    4*H2)
                     wfc_ref,       # (1, H2)        PyTorch layout
                     bfc_ref,       # (1, 1)
                     out_ref):      # (TB, T_out)
    TB, T_out = out_ref.shape
    T_in, _, D_in = inp_ref.shape
    H1 = whh1_ref.shape[0]
    H2 = whh2_ref.shape[0]

    covar = covar_ref[...]

    # ---- Encoder (LSTM layer 1): input projection hoisted out of the recurrence.
    cov_g1 = (jnp.dot(covar, wih1_cv_ref[...], preferred_element_type=jnp.float32)
              + b1_ref[...])                                        # (TB, 4H1), once
    if D_in == 1:
        # outer product as a broadcast multiply for all T_in steps (no K=1 matmul)
        xg_all = inp_ref[...] * wih1_in_ref[...][None]              # (T_in, TB, 4H1)
    else:
        xg_all = None   # generic D_in: per-step dot below (off the dep chain)

    whh1 = whh1_ref[...]
    h = jnp.zeros((TB, H1), jnp.float32)
    c = jnp.zeros((TB, H1), jnp.float32)
    for t in range(T_in):                        # static trip count, fully unrolled
        if D_in == 1:
            xg = xg_all[t]                                          # (TB, 4H1)
        else:
            xg = jnp.dot(inp_ref[t], wih1_in_ref[...],
                         preferred_element_type=jnp.float32)
        h, c = _lstm_cell(xg + cov_g1, h, c, whh1, H1)
    h1 = jnp.maximum(h, 0.0)                     # F.relu(hn[-1])

    # ---- Decoder (LSTM layer 2): the same input vector every step -> project once.
    # Two dots summed instead of a lane-axis concat of (TB,H1) and (TB,C).
    xg2 = (jnp.dot(h1, wih2_h_ref[...], preferred_element_type=jnp.float32)
           + jnp.dot(covar, wih2_c_ref[...], preferred_element_type=jnp.float32)
           + b2_ref[...])                                           # (TB, 4H2), once

    whh2 = whh2_ref[...]
    wfc = wfc_ref[...]                                              # (1, H2)
    bfc = bfc_ref[...]                                              # (1, 1)
    h = jnp.zeros((TB, H2), jnp.float32)
    c = jnp.zeros((TB, H2), jnp.float32)
    # TODO(synk): nn.Dropout(0.2) is an inference-time identity (and its result is
    # unused in the torch forward), so it is intentionally omitted.
    for t in range(T_out):                       # static trip count, fully unrolled
        h, c = _lstm_cell(xg2, h, c, whh2, H2)
        hr = jnp.maximum(h, 0.0)                 # F.relu(output)
        # FC head fused per step (output_size == 1); off the recurrent dep chain.
        y = jnp.sum(hr * wfc, axis=1, keepdims=True) + bfc          # (TB, 1)
        out_ref[:, t:t + 1] = y


def multistep_forward(params, inp, covar, output_seq_len):
    B, T_in, D_in = inp.shape
    C = covar.shape[1]
    T_out = int(output_seq_len)

    # Pad batch to the f32 sublane extent (8); large batches are split into TB-row
    # tiles on a "parallel" grid axis (megacore on v7x, bounded VMEM per step).
    B8 = ((B + 7) // 8) * 8
    if B8 <= 256:
        TB = B8
        B_pad = B8
    else:
        TB = 256
        B_pad = ((B8 + TB - 1) // TB) * TB
    if B_pad != B:
        inp = jnp.pad(inp, ((0, B_pad - B), (0, 0), (0, 0)))
        covar = jnp.pad(covar, ((0, B_pad - B), (0, 0)))

    # Time-major input; the big (B, T_in, 1+C) covar-broadcast / concat of the torch
    # forward is never materialized.
    inp_tm = jnp.transpose(inp.astype(jnp.float32), (1, 0, 2))   # (T_in, B_pad, D_in)
    covar = covar.astype(jnp.float32)

    def full_spec(shape):
        return pl.BlockSpec(shape, lambda b: (0, 0))

    in_specs = [
        pl.BlockSpec((T_in, TB, D_in), lambda b: (0, b, 0)),     # inp (batch-tiled)
        pl.BlockSpec((TB, C), lambda b: (b, 0)),                  # covar (batch-tiled)
        full_spec(params["wih1_in"].shape),
        full_spec(params["wih1_cv"].shape),
        full_spec(params["whh1"].shape),
        full_spec(params["b1"].shape),
        full_spec(params["wih2_h"].shape),
        full_spec(params["wih2_c"].shape),
        full_spec(params["whh2"].shape),
        full_spec(params["b2"].shape),
        full_spec(params["wfc"].shape),
        full_spec(params["bfc"].shape),
    ]
    out_specs = pl.BlockSpec((TB, T_out), lambda b: (b, 0))

    out = pl.pallas_call(
        multistep_kernel,
        out_shape=jax.ShapeDtypeStruct((B_pad, T_out), jnp.float32),
        grid=(B_pad // TB,),
        in_specs=in_specs,
        out_specs=out_specs,
        compiler_params=pltpu.CompilerParams(dimension_semantics=("parallel",)),
    )(inp_tm, covar,
      params["wih1_in"], params["wih1_cv"], params["whh1"], params["b1"],
      params["wih2_h"], params["wih2_c"], params["whh2"], params["b2"],
      params["wfc"], params["bfc"])

    # torch: fc(...).squeeze() -> (B, T_out) for B > 1, (T_out,) for B == 1.
    return jnp.squeeze(out[:B])


def init_params(key, input_size, covar_size, h1, h2, output_size,
                recurrent_dtype=jnp.float32):
    """PyTorch-default init U(-1/sqrt(H), 1/sqrt(H)), repacked for the kernel.

    recurrent_dtype=bfloat16 stores whh1/whh2 in bf16 (single-pass MXU on the
    per-step critical path); everything else stays f32.
    """
    d1 = input_size + covar_size
    d2 = h1 + covar_size
    ks = jax.random.split(key, 10)

    def u(k, shape, bound):
        return jax.random.uniform(k, shape, jnp.float32, -bound, bound)

    s1 = 1.0 / float(np.sqrt(h1))
    s2 = 1.0 / float(np.sqrt(h2))
    wih1 = u(ks[0], (4 * h1, d1), s1)          # PyTorch layout (4H, D)
    whh1 = u(ks[1], (4 * h1, h1), s1)
    bih1 = u(ks[2], (4 * h1,), s1)
    bhh1 = u(ks[3], (4 * h1,), s1)
    wih2 = u(ks[4], (4 * h2, d2), s2)
    whh2 = u(ks[5], (4 * h2, h2), s2)
    bih2 = u(ks[6], (4 * h2,), s2)
    bhh2 = u(ks[7], (4 * h2,), s2)
    wfc = u(ks[8], (output_size, h2), s2)
    bfc = u(ks[9], (output_size,), s2)
    return {
        # layer-1 input->gate weights split into input / covar blocks, (in_dim, 4H)
        "wih1_in": wih1[:, :input_size].T,
        "wih1_cv": wih1[:, input_size:].T,
        "whh1": whh1.T.astype(recurrent_dtype),
        "b1": (bih1 + bhh1)[None, :],
        # layer-2 input->gate weights split into hidden / covar blocks
        "wih2_h": wih2[:, :h1].T,
        "wih2_c": wih2[:, h1:].T,
        "whh2": whh2.T.astype(recurrent_dtype),
        "b2": (bih2 + bhh2)[None, :],
        "wfc": wfc,                      # (1, H2), PyTorch layout
        "bfc": bfc[None, :],             # (1, 1)
    }


def reference_forward(params, inp, covar, output_seq_len, h1_dim, h2_dim):
    """Pure-JAX f32 reference reproducing the torch forward (same weight values)."""
    B, T_in, _ = inp.shape
    C = covar.shape[1]
    wih1 = jnp.concatenate([params["wih1_in"], params["wih1_cv"]], axis=0).astype(jnp.float32)
    wih2 = jnp.concatenate([params["wih2_h"], params["wih2_c"]], axis=0).astype(jnp.float32)
    whh1 = params["whh1"].astype(jnp.float32)
    whh2 = params["whh2"].astype(jnp.float32)

    def run_lstm(x, wih, whh, b, H):
        def step(carry, x_t):
            h, c = carry
            gates = x_t @ wih + h @ whh + b
            i = jax.nn.sigmoid(gates[:, :H])
            f = jax.nn.sigmoid(gates[:, H:2 * H])
            g = jnp.tanh(gates[:, 2 * H:3 * H])
            o = jax.nn.sigmoid(gates[:, 3 * H:])
            c = f * c + i * g
            h = o * jnp.tanh(c)
            return (h, c), h
        init = (jnp.zeros((B, H), jnp.float32), jnp.zeros((B, H), jnp.float32))
        (h, _), hs = lax.scan(step, init, jnp.swapaxes(x, 0, 1))
        return jnp.swapaxes(hs, 0, 1), h

    covar_rep = jnp.broadcast_to(covar[:, None, :], (B, T_in, C))
    x1 = jnp.concatenate([inp, covar_rep], axis=2)
    _, hn1 = run_lstm(x1, wih1, whh1, params["b1"], h1_dim)
    h1 = jnp.maximum(hn1, 0.0)

    x2 = jnp.concatenate([h1, covar], axis=1)
    x2_rep = jnp.broadcast_to(x2[:, None, :], (B, output_seq_len, x2.shape[1]))
    hs2, _ = run_lstm(x2_rep, wih2, whh2, params["b2"], h2_dim)
    h2 = jnp.maximum(hs2, 0.0)
    out = h2 @ params["wfc"].T + params["bfc"]
    return jnp.squeeze(out)


if __name__ == "__main__":
    # Small shapes consistent with the module's forward.
    input_size, covar_size, output_size = 1, 16, 1
    output_seq_len, h1_dim, h2_dim = 12, 32, 32
    B, T_in = 2, 8

    key = jax.random.PRNGKey(0)
    kp, ki, kc = jax.random.split(key, 3)
    inp = jax.random.normal(ki, (B, T_in, input_size), jnp.float32)
    covar = jax.random.normal(kc, (B, covar_size), jnp.float32)

    # ---- exact f32 weights: matches the PyTorch module numerics (tight tolerance).
    params_f32 = init_params(kp, input_size, covar_size, h1_dim, h2_dim,
                             output_size, recurrent_dtype=jnp.float32)
    out_f32 = jax.block_until_ready(
        multistep_forward(params_f32, inp, covar, output_seq_len))
    ref_f32 = reference_forward(params_f32, inp, covar, output_seq_len, h1_dim, h2_dim)
    assert out_f32.shape == (B, output_seq_len), out_f32.shape
    np.testing.assert_allclose(np.asarray(out_f32), np.asarray(ref_f32),
                               rtol=1e-3, atol=1e-4)

    # ---- bf16 recurrent weights (perf variant): compare against an f32 reference
    # using the same bf16-rounded weight values; tolerance loosened because the
    # LSTM recurrence amplifies small operand-precision differences over 20 steps.
    params_bf16 = init_params(kp, input_size, covar_size, h1_dim, h2_dim,
                              output_size, recurrent_dtype=jnp.bfloat16)
    out_b = jax.block_until_ready(
        multistep_forward(params_bf16, inp, covar, output_seq_len))
    ref_b = reference_forward(params_bf16, inp, covar, output_seq_len, h1_dim, h2_dim)
    np.testing.assert_allclose(np.asarray(out_b), np.asarray(ref_b),
                               rtol=2e-2, atol=2e-2)

    print("KERNEL_OK")
</pallas_src>

<mosaic_0001>
module attributes {stable_mosaic.version = 11 : i64} {
  func.func @multistep_kernel(%arg0: i32, %arg1: memref<8x8x1xf32, #tpu.memory_space<vmem>>, %arg2: memref<8x16xf32, #tpu.memory_space<vmem>>, %arg3: memref<1x128xf32, #tpu.memory_space<vmem>>, %arg4: memref<16x128xf32, #tpu.memory_space<vmem>>, %arg5: memref<32x128xf32, #tpu.memory_space<vmem>>, %arg6: memref<1x128xf32, #tpu.memory_space<vmem>>, %arg7: memref<32x128xf32, #tpu.memory_space<vmem>>, %arg8: memref<16x128xf32, #tpu.memory_space<vmem>>, %arg9: memref<32x128xf32, #tpu.memory_space<vmem>>, %arg10: memref<1x128xf32, #tpu.memory_space<vmem>>, %arg11: memref<1x32xf32, #tpu.memory_space<vmem>>, %arg12: memref<1x1xf32, #tpu.memory_space<vmem>>, %arg13: memref<8x12xf32, #tpu.memory_space<vmem>>) attributes {dimension_semantics = [#tpu.dimension_semantics<parallel>], iteration_bounds = array<i64: 1>, scalar_prefetch = 0 : i64, scratch_operands = 0 : i64, tpu.core_type = #tpu.core_type<tc>, window_params = [{transform_indices = @transform_0, window_bounds = array<i64: 8, 8, 1>}, {transform_indices = @transform_1, window_bounds = array<i64: 8, 16>}, {pipeline_mode = #tpu.pipeline_mode<synchronous>, transform_indices = @transform_2, window_bounds = array<i64: 1, 128>}, {pipeline_mode = #tpu.pipeline_mode<synchronous>, transform_indices = @transform_3, window_bounds = array<i64: 16, 128>}, {pipeline_mode = #tpu.pipeline_mode<synchronous>, transform_indices = @transform_4, window_bounds = array<i64: 32, 128>}, {pipeline_mode = #tpu.pipeline_mode<synchronous>, transform_indices = @transform_5, window_bounds = array<i64: 1, 128>}, {pipeline_mode = #tpu.pipeline_mode<synchronous>, transform_indices = @transform_6, window_bounds = array<i64: 32, 128>}, {pipeline_mode = #tpu.pipeline_mode<synchronous>, transform_indices = @transform_7, window_bounds = array<i64: 16, 128>}, {pipeline_mode = #tpu.pipeline_mode<synchronous>, transform_indices = @transform_8, window_bounds = array<i64: 32, 128>}, {pipeline_mode = #tpu.pipeline_mode<synchronous>, transform_indices = @transform_9, window_bounds = array<i64: 1, 128>}, {pipeline_mode = #tpu.pipeline_mode<synchronous>, transform_indices = @transform_10, window_bounds = array<i64: 1, 32>}, {pipeline_mode = #tpu.pipeline_mode<synchronous>, transform_indices = @transform_11, window_bounds = array<i64: 1, 1>}, {transform_indices = @transform_12, window_bounds = array<i64: 8, 12>}]} {
    %c0 = arith.constant 0 : index
    %c0_0 = arith.constant 0 : index
    %0 = vector.load %arg2[%c0, %c0_0] : memref<8x16xf32, #tpu.memory_space<vmem>>, vector<8x16xf32>
    %c0_1 = arith.constant 0 : index
    %c0_2 = arith.constant 0 : index
    %1 = vector.load %arg4[%c0_1, %c0_2] : memref<16x128xf32, #tpu.memory_space<vmem>>, vector<16x128xf32>
    %cst = arith.constant dense<0.000000e+00> : vector<8x128xf32>
    %2 = tpu.matmul %0, %1, %cst {dimension_numbers = #tpu.dot_dimension_numbers<[1], [0], [0], [1], [0, 0, 1, 1], [], []>} : vector<8x16xf32>, vector<16x128xf32>, vector<8x128xf32> -> vector<8x128xf32>
    %c0_3 = arith.constant 0 : index
    %c0_4 = arith.constant 0 : index
    %3 = vector.load %arg6[%c0_3, %c0_4] : memref<1x128xf32, #tpu.memory_space<vmem>>, vector<1x128xf32>
    %4 = vector.broadcast %3 : vector<1x128xf32> to vector<8x128xf32>
    %5 = arith.addf %2, %4 : vector<8x128xf32>
    %c0_5 = arith.constant 0 : index
    %c0_6 = arith.constant 0 : index
    %c0_7 = arith.constant 0 : index
    %6 = vector.load %arg1[%c0_5, %c0_6, %c0_7] : memref<8x8x1xf32, #tpu.memory_space<vmem>>, vector<8x8x1xf32>
    %c0_8 = arith.constant 0 : index
    %c0_9 = arith.constant 0 : index
    %7 = vector.load %arg3[%c0_8, %c0_9] : memref<1x128xf32, #tpu.memory_space<vmem>>, vector<1x128xf32>
    %8 = vector.shape_cast %7 : vector<1x128xf32> to vector<1x1x128xf32>
    %9 = vector.broadcast %6 : vector<8x8x1xf32> to vector<8x8x128xf32>
    %10 = vector.broadcast %8 : vector<1x1x128xf32> to vector<8x8x128xf32>
    %11 = arith.mulf %9, %10 : vector<8x8x128xf32>
    %c0_10 = arith.constant 0 : index
    %c0_11 = arith.constant 0 : index
    %12 = vector.load %arg5[%c0_10, %c0_11] : memref<32x128xf32, #tpu.memory_space<vmem>>, vector<32x128xf32>
    %cst_12 = arith.constant 0.000000e+00 : f32
    %13 = vector.broadcast %cst_12 : f32 to vector<8x32xf32>
    %cst_13 = arith.constant 0.000000e+00 : f32
    %14 = vector.broadcast %cst_13 : f32 to vector<8x32xf32>
    %15 = vector.extract_strided_slice %11 {offsets = [0, 0, 0], sizes = [1, 8, 128], strides = [1, 1, 1]} : vector<8x8x128xf32> to vector<1x8x128xf32>
    %16 = vector.shape_cast %15 : vector<1x8x128xf32> to vector<8x128xf32>
    %17 = arith.addf %16, %5 : vector<8x128xf32>
    %cst_14 = arith.constant dense<0.000000e+00> : vector<8x128xf32>
    %18 = tpu.matmul %13, %12, %cst_14 {dimension_numbers = #tpu.dot_dimension_numbers<[1], [0], [0], [1], [0, 0, 1, 1], [], []>} : vector<8x32xf32>, vector<32x128xf32>, vector<8x128xf32> -> vector<8x128xf32>
    %19 = arith.addf %17, %18 : vector<8x128xf32>
    %20 = arith.negf %19 : vector<8x128xf32>
    %21 = math.exp %20 : vector<8x128xf32>
    %cst_15 = arith.constant 1.000000e+00 : f32
    %22 = vector.broadcast %cst_15 : f32 to vector<8x128xf32>
    %23 = arith.addf %22, %21 : vector<8x128xf32>
    %24 = arith.divf %22, %23 : vector<8x128xf32>
    %25 = math.tanh %19 : vector<8x128xf32>
    %26 = vector.extract_strided_slice %24 {offsets = [0, 0], sizes = [8, 32], strides = [1, 1]} : vector<8x128xf32> to vector<8x32xf32>
    %27 = vector.extract_strided_slice %24 {offsets = [0, 32], sizes = [8, 32], strides = [1, 1]} : vector<8x128xf32> to vector<8x32xf32>
    %28 = vector.extract_strided_slice %25 {offsets = [0, 64], sizes = [8, 32], strides = [1, 1]} : vector<8x128xf32> to vector<8x32xf32>
    %29 = vector.extract_strided_slice %24 {offsets = [0, 96], sizes = [8, 32], strides = [1, 1]} : vector<8x128xf32> to vector<8x32xf32>
    %30 = arith.mulf %27, %14 : vector<8x32xf32>
    %31 = arith.mulf %26, %28 : vector<8x32xf32>
    %32 = arith.addf %30, %31 : vector<8x32xf32>
    %33 = math.tanh %32 : vector<8x32xf32>
    %34 = arith.mulf %29, %33 : vector<8x32xf32>
    %35 = vector.extract_strided_slice %11 {offsets = [1, 0, 0], sizes = [1, 8, 128], strides = [1, 1, 1]} : vector<8x8x128xf32> to vector<1x8x128xf32>
    %36 = vector.shape_cast %35 : vector<1x8x128xf32> to vector<8x128xf32>
    %37 = arith.addf %36, %5 : vector<8x128xf32>
    %cst_16 = arith.constant dense<0.000000e+00> : vector<8x128xf32>
    %38 = tpu.matmul %34, %12, %cst_16 {dimension_numbers = #tpu.dot_dimension_numbers<[1], [0], [0], [1], [0, 0, 1, 1], [], []>} : vector<8x32xf32>, vector<32x128xf32>, vector<8x128xf32> -> vector<8x128xf32>
    %39 = arith.addf %37, %38 : vector<8x128xf32>
    %40 = arith.negf %39 : vector<8x128xf32>
    %41 = math.exp %40 : vector<8x128xf32>
    %cst_17 = arith.constant 1.000000e+00 : f32
    %42 = vector.broadcast %cst_17 : f32 to vector<8x128xf32>
    %43 = arith.addf %42, %41 : vector<8x128xf32>
    %44 = arith.divf %42, %43 : vector<8x128xf32>
    %45 = math.tanh %39 : vector<8x128xf32>
    %46 = vector.extract_strided_slice %44 {offsets = [0, 0], sizes = [8, 32], strides = [1, 1]} : vector<8x128xf32> to vector<8x32xf32>
    %47 = vector.extract_strided_slice %44 {offsets = [0, 32], sizes = [8, 32], strides = [1, 1]} : vector<8x128xf32> to vector<8x32xf32>
    %48 = vector.extract_strided_slice %45 {offsets = [0, 64], sizes = [8, 32], strides = [1, 1]} : vector<8x128xf32> to vector<8x32xf32>
    %49 = vector.extract_strided_slice %44 {offsets = [0, 96], sizes = [8, 32], strides = [1, 1]} : vector<8x128xf32> to vector<8x32xf32>
    %50 = arith.mulf %47, %32 : vector<8x32xf32>
    %51 = arith.mulf %46, %48 : vector<8x32xf32>
    %52 = arith.addf %50, %51 : vector<8x32xf32>
    %53 = math.tanh %52 : vector<8x32xf32>
    %54 = arith.mulf %49, %53 : vector<8x32xf32>
    %55 = vector.extract_strided_slice %11 {offsets = [2, 0, 0], sizes = [1, 8, 128], strides = [1, 1, 1]} : vector<8x8x128xf32> to vector<1x8x128xf32>
    %56 = vector.shape_cast %55 : vector<1x8x128xf32> to vector<8x128xf32>
    %57 = arith.addf %56, %5 : vector<8x128xf32>
    %cst_18 = arith.constant dense<0.000000e+00> : vector<8x128xf32>
    %58 = tpu.matmul %54, %12, %cst_18 {dimension_numbers = #tpu.dot_dimension_numbers<[1], [0], [0], [1], [0, 0, 1, 1], [], []>} : vector<8x32xf32>, vector<32x128xf32>, vector<8x128xf32> -> vector<8x128xf32>
    %59 = arith.addf %57, %58 : vector<8x128xf32>
    %60 = arith.negf %59 : vector<8x128xf32>
    %61 = math.exp %60 : vector<8x128xf32>
    %cst_19 = arith.constant 1.000000e+00 : f32
    %62 = vector.broadcast %cst_19 : f32 to vector<8x128xf32>
    %63 = arith.addf %62, %61 : vector<8x128xf32>
    %64 = arith.divf %62, %63 : vector<8x128xf32>
    %65 = math.tanh %59 : vector<8x128xf32>
    %66 = vector.extract_strided_slice %64 {offsets = [0, 0], sizes = [8, 32], strides = [1, 1]} : vector<8x128xf32> to vector<8x32xf32>
    %67 = vector.extract_strided_slice %64 {offsets = [0, 32], sizes = [8, 32], strides = [1, 1]} : vector<8x128xf32> to vector<8x32xf32>
    %68 = vector.extract_strided_slice %65 {offsets = [0, 64], sizes = [8, 32], strides = [1, 1]} : vector<8x128xf32> to vector<8x32xf32>
    %69 = vector.extract_strided_slice %64 {offsets = [0, 96], sizes = [8, 32], strides = [1, 1]} : vector<8x128xf32> to vector<8x32xf32>
    %70 = arith.mulf %67, %52 : vector<8x32xf32>
    %71 = arith.mulf %66, %68 : vector<8x32xf32>
    %72 = arith.addf %70, %71 : vector<8x32xf32>
    %73 = math.tanh %72 : vector<8x32xf32>
    %74 = arith.mulf %69, %73 : vector<8x32xf32>
    %75 = vector.extract_strided_slice %11 {offsets = [3, 0, 0], sizes = [1, 8, 128], strides = [1, 1, 1]} : vector<8x8x128xf32> to vector<1x8x128xf32>
    %76 = vector.shape_cast %75 : vector<1x8x128xf32> to vector<8x128xf32>
    %77 = arith.addf %76, %5 : vector<8x128xf32>
    %cst_20 = arith.constant dense<0.000000e+00> : vector<8x128xf32>
    %78 = tpu.matmul %74, %12, %cst_20 {dimension_numbers = #tpu.dot_dimension_numbers<[1], [0], [0], [1], [0, 0, 1, 1], [], []>} : vector<8x32xf32>, vector<32x128xf32>, vector<8x128xf32> -> vector<8x128xf32>
    %79 = arith.addf %77, %78 : vector<8x128xf32>
    %80 = arith.negf %79 : vector<8x128xf32>
    %81 = math.exp %80 : vector<8x128xf32>
    %cst_21 = arith.constant 1.000000e+00 : f32
    %82 = vector.broadcast %cst_21 : f32 to vector<8x128xf32>
    %83 = arith.addf %82, %81 : vector<8x128xf32>
    %84 = arith.divf %82, %83 : vector<8x128xf32>
    %85 = math.tanh %79 : vector<8x128xf32>
    %86 = vector.extract_strided_slice %84 {offsets = [0, 0], sizes = [8, 32], strides = [1, 1]} : vector<8x128xf32> to vector<8x32xf32>
    %87 = vector.extract_strided_slice %84 {offsets = [0, 32], sizes = [8, 32], strides = [1, 1]} : vector<8x128xf32> to vector<8x32xf32>
    %88 = vector.extract_strided_slice %85 {offsets = [0, 64], sizes = [8, 32], strides = [1, 1]} : vector<8x128xf32> to vector<8x32xf32>
    %89 = vector.extract_strided_slice %84 {offsets = [0, 96], sizes = [8, 32], strides = [1, 1]} : vector<8x128xf32> to vector<8x32xf32>
    %90 = arith.mulf %87, %72 : vector<8x32xf32>
    %91 = arith.mulf %86, %88 : vector<8x32xf32>
    %92 = arith.addf %90, %91 : vector<8x32xf32>
    %93 = math.tanh %92 : vector<8x32xf32>
    %94 = arith.mulf %89, %93 : vector<8x32xf32>
    %95 = vector.extract_strided_slice %11 {offsets = [4, 0, 0], sizes = [1, 8, 128], strides = [1, 1, 1]} : vector<8x8x128xf32> to vector<1x8x128xf32>
    %96 = vector.shape_cast %95 : vector<1x8x128xf32> to vector<8x128xf32>
    %97 = arith.addf %96, %5 : vector<8x128xf32>
    %cst_22 = arith.constant dense<0.000000e+00> : vector<8x128xf32>
    %98 = tpu.matmul %94, %12, %cst_22 {dimension_numbers = #tpu.dot_dimension_numbers<[1], [0], [0], [1], [0, 0, 1, 1], [], []>} : vector<8x32xf32>, vector<32x128xf32>, vector<8x128xf32> -> vector<8x128xf32>
    %99 = arith.addf %97, %98 : vector<8x128xf32>
    %100 = arith.negf %99 : vector<8x128xf32>
    %101 = math.exp %100 : vector<8x128xf32>
    %cst_23 = arith.constant 1.000000e+00 : f32
    %102 = vector.broadcast %cst_23 : f32 to vector<8x128xf32>
    %103 = arith.addf %102, %101 : vector<8x128xf32>
    %104 = arith.divf %102, %103 : vector<8x128xf32>
    %105 = math.tanh %99 : vector<8x128xf32>
    %106 = vector.extract_strided_slice %104 {offsets = [0, 0], sizes = [8, 32], strides = [1, 1]} : vector<8x128xf32> to vector<8x32xf32>
    %107 = vector.extract_strided_slice %104 {offsets = [0, 32], sizes = [8, 32], strides = [1, 1]} : vector<8x128xf32> to vector<8x32xf32>
    %108 = vector.extract_strided_slice %105 {offsets = [0, 64], sizes = [8, 32], strides = [1, 1]} : vector<8x128xf32> to vector<8x32xf32>
    %109 = vector.extract_strided_slice %104 {offsets = [0, 96], sizes = [8, 32], strides = [1, 1]} : vector<8x128xf32> to vector<8x32xf32>
    %110 = arith.mulf %107, %92 : vector<8x32xf32>
    %111 = arith.mulf %106, %108 : vector<8x32xf32>
    %112 = arith.addf %110, %111 : vector<8x32xf32>
    %113 = math.tanh %112 : vector<8x32xf32>
    %114 = arith.mulf %109, %113 : vector<8x32xf32>
    %115 = vector.extract_strided_slice %11 {offsets = [5, 0, 0], sizes = [1, 8, 128], strides = [1, 1, 1]} : vector<8x8x128xf32> to vector<1x8x128xf32>
    %116 = vector.shape_cast %115 : vector<1x8x128xf32> to vector<8x128xf32>
    %117 = arith.addf %116, %5 : vector<8x128xf32>
    %cst_24 = arith.constant dense<0.000000e+00> : vector<8x128xf32>
    %118 = tpu.matmul %114, %12, %cst_24 {dimension_numbers = #tpu.dot_dimension_numbers<[1], [0], [0], [1], [0, 0, 1, 1], [], []>} : vector<8x32xf32>, vector<32x128xf32>, vector<8x128xf32> -> vector<8x128xf32>
    %119 = arith.addf %117, %118 : vector<8x128xf32>
    %120 = arith.negf %119 : vector<8x128xf32>
    %121 = math.exp %120 : vector<8x128xf32>
    %cst_25 = arith.constant 1.000000e+00 : f32
    %122 = vector.broadcast %cst_25 : f32 to vector<8x128xf32>
    %123 = arith.addf %122, %121 : vector<8x128xf32>
    %124 = arith.divf %122, %123 : vector<8x128xf32>
    %125 = math.tanh %119 : vector<8x128xf32>
    %126 = vector.extract_strided_slice %124 {offsets = [0, 0], sizes = [8, 32], strides = [1, 1]} : vector<8x128xf32> to vector<8x32xf32>
    %127 = vector.extract_strided_slice %124 {offsets = [0, 32], sizes = [8, 32], strides = [1, 1]} : vector<8x128xf32> to vector<8x32xf32>
    %128 = vector.extract_strided_slice %125 {offsets = [0, 64], sizes = [8, 32], strides = [1, 1]} : vector<8x128xf32> to vector<8x32xf32>
    %129 = vector.extract_strided_slice %124 {offsets = [0, 96], sizes = [8, 32], strides = [1, 1]} : vector<8x128xf32> to vector<8x32xf32>
    %130 = arith.mulf %127, %112 : vector<8x32xf32>
    %131 = arith.mulf %126, %128 : vector<8x32xf32>
    %132 = arith.addf %130, %131 : vector<8x32xf32>
    %133 = math.tanh %132 : vector<8x32xf32>
    %134 = arith.mulf %129, %133 : vector<8x32xf32>
    %135 = vector.extract_strided_slice %11 {offsets = [6, 0, 0], sizes = [1, 8, 128], strides = [1, 1, 1]} : vector<8x8x128xf32> to vector<1x8x128xf32>
    %136 = vector.shape_cast %135 : vector<1x8x128xf32> to vector<8x128xf32>
    %137 = arith.addf %136, %5 : vector<8x128xf32>
    %cst_26 = arith.constant dense<0.000000e+00> : vector<8x128xf32>
    %138 = tpu.matmul %134, %12, %cst_26 {dimension_numbers = #tpu.dot_dimension_numbers<[1], [0], [0], [1], [0, 0, 1, 1], [], []>} : vector<8x32xf32>, vector<32x128xf32>, vector<8x128xf32> -> vector<8x128xf32>
    %139 = arith.addf %137, %138 : vector<8x128xf32>
    %140 = arith.negf %139 : vector<8x128xf32>
    %141 = math.exp %140 : vector<8x128xf32>
    %cst_27 = arith.constant 1.000000e+00 : f32
    %142 = vector.broadcast %cst_27 : f32 to vector<8x128xf32>
    %143 = arith.addf %142, %141 : vector<8x128xf32>
    %144 = arith.divf %142, %143 : vector<8x128xf32>
    %145 = math.tanh %139 : vector<8x128xf32>
    %146 = vector.extract_strided_slice %144 {offsets = [0, 0], sizes = [8, 32], strides = [1, 1]} : vector<8x128xf32> to vector<8x32xf32>
    %147 = vector.extract_strided_slice %144 {offsets = [0, 32], sizes = [8, 32], strides = [1, 1]} : vector<8x128xf32> to vector<8x32xf32>
    %148 = vector.extract_strided_slice %145 {offsets = [0, 64], sizes = [8, 32], strides = [1, 1]} : vector<8x128xf32> to vector<8x32xf32>
    %149 = vector.extract_strided_slice %144 {offsets = [0, 96], sizes = [8, 32], strides = [1, 1]} : vector<8x128xf32> to vector<8x32xf32>
    %150 = arith.mulf %147, %132 : vector<8x32xf32>
    %151 = arith.mulf %146, %148 : vector<8x32xf32>
    %152 = arith.addf %150, %151 : vector<8x32xf32>
    %153 = math.tanh %152 : vector<8x32xf32>
    %154 = arith.mulf %149, %153 : vector<8x32xf32>
    %155 = vector.extract_strided_slice %11 {offsets = [7, 0, 0], sizes = [1, 8, 128], strides = [1, 1, 1]} : vector<8x8x128xf32> to vector<1x8x128xf32>
    %156 = vector.shape_cast %155 : vector<1x8x128xf32> to vector<8x128xf32>
    %157 = arith.addf %156, %5 : vector<8x128xf32>
    %cst_28 = arith.constant dense<0.000000e+00> : vector<8x128xf32>
    %158 = tpu.matmul %154, %12, %cst_28 {dimension_numbers = #tpu.dot_dimension_numbers<[1], [0], [0], [1], [0, 0, 1, 1], [], []>} : vector<8x32xf32>, vector<32x128xf32>, vector<8x128xf32> -> vector<8x128xf32>
    %159 = arith.addf %157, %158 : vector<8x128xf32>
    %160 = arith.negf %159 : vector<8x128xf32>
    %161 = math.exp %160 : vector<8x128xf32>
    %cst_29 = arith.constant 1.000000e+00 : f32
    %162 = vector.broadcast %cst_29 : f32 to vector<8x128xf32>
    %163 = arith.addf %162, %161 : vector<8x128xf32>
    %164 = arith.divf %162, %163 : vector<8x128xf32>
    %165 = math.tanh %159 : vector<8x128xf32>
    %166 = vector.extract_strided_slice %164 {offsets = [0, 0], sizes = [8, 32], strides = [1, 1]} : vector<8x128xf32> to vector<8x32xf32>
    %167 = vector.extract_strided_slice %164 {offsets = [0, 32], sizes = [8, 32], strides = [1, 1]} : vector<8x128xf32> to vector<8x32xf32>
    %168 = vector.extract_strided_slice %165 {offsets = [0, 64], sizes = [8, 32], strides = [1, 1]} : vector<8x128xf32> to vector<8x32xf32>
    %169 = vector.extract_strided_slice %164 {offsets = [0, 96], sizes = [8, 32], strides = [1, 1]} : vector<8x128xf32> to vector<8x32xf32>
    %170 = arith.mulf %167, %152 : vector<8x32xf32>
    %171 = arith.mulf %166, %168 : vector<8x32xf32>
    %172 = arith.addf %170, %171 : vector<8x32xf32>
    %173 = math.tanh %172 : vector<8x32xf32>
    %174 = arith.mulf %169, %173 : vector<8x32xf32>
    %cst_30 = arith.constant 0.000000e+00 : f32
    %175 = vector.broadcast %cst_30 : f32 to vector<8x32xf32>
    %176 = arith.maximumf %174, %175 : vector<8x32xf32>
    %c0_31 = arith.constant 0 : index
    %c0_32 = arith.constant 0 : index
    %177 = vector.load %arg7[%c0_31, %c0_32] : memref<32x128xf32, #tpu.memory_space<vmem>>, vector<32x128xf32>
    %cst_33 = arith.constant dense<0.000000e+00> : vector<8x128xf32>
    %178 = tpu.matmul %176, %177, %cst_33 {dimension_numbers = #tpu.dot_dimension_numbers<[1], [0], [0], [1], [0, 0, 1, 1], [], []>} : vector<8x32xf32>, vector<32x128xf32>, vector<8x128xf32> -> vector<8x128xf32>
    %c0_34 = arith.constant 0 : index
    %c0_35 = arith.constant 0 : index
    %179 = vector.load %arg8[%c0_34, %c0_35] : memref<16x128xf32, #tpu.memory_space<vmem>>, vector<16x128xf32>
    %cst_36 = arith.constant dense<0.000000e+00> : vector<8x128xf32>
    %180 = tpu.matmul %0, %179, %cst_36 {dimension_numbers = #tpu.dot_dimension_numbers<[1], [0], [0], [1], [0, 0, 1, 1], [], []>} : vector<8x16xf32>, vector<16x128xf32>, vector<8x128xf32> -> vector<8x128xf32>
    %181 = arith.addf %178, %180 : vector<8x128xf32>
    %c0_37 = arith.constant 0 : index
    %c0_38 = arith.constant 0 : index
    %182 = vector.load %arg10[%c0_37, %c0_38] : memref<1x128xf32, #tpu.memory_space<vmem>>, vector<1x128xf32>
    %183 = vector.broadcast %182 : vector<1x128xf32> to vector<8x128xf32>
    %184 = arith.addf %181, %183 : vector<8x128xf32>
    %c0_39 = arith.constant 0 : index
    %c0_40 = arith.constant 0 : index
    %185 = vector.load %arg9[%c0_39, %c0_40] : memref<32x128xf32, #tpu.memory_space<vmem>>, vector<32x128xf32>
    %c0_41 = arith.constant 0 : index
    %c0_42 = arith.constant 0 : index
    %186 = vector.load %arg11[%c0_41, %c0_42] : memref<1x32xf32, #tpu.memory_space<vmem>>, vector<1x32xf32>
    %c0_43 = arith.constant 0 : index
    %c0_44 = arith.constant 0 : index
    %187 = vector.load %arg12[%c0_43, %c0_44] : memref<1x1xf32, #tpu.memory_space<vmem>>, vector<1x1xf32>
    %cst_45 = arith.constant 0.000000e+00 : f32
    %188 = vector.broadcast %cst_45 : f32 to vector<8x32xf32>
    %cst_46 = arith.constant 0.000000e+00 : f32
    %189 = vector.broadcast %cst_46 : f32 to vector<8x32xf32>
    %cst_47 = arith.constant dense<0.000000e+00> : vector<8x128xf32>
    %190 = tpu.matmul %188, %185, %cst_47 {dimension_numbers = #tpu.dot_dimension_numbers<[1], [0], [0], [1], [0, 0, 1, 1], [], []>} : vector<8x32xf32>, vector<32x128xf32>, vector<8x128xf32> -> vector<8x128xf32>
    %191 = arith.addf %184, %190 : vector<8x128xf32>
    %192 = arith.negf %191 : vector<8x128xf32>
    %193 = math.exp %192 : vector<8x128xf32>
    %cst_48 = arith.constant 1.000000e+00 : f32
    %194 = vector.broadcast %cst_48 : f32 to vector<8x128xf32>
    %195 = arith.addf %194, %193 : vector<8x128xf32>
    %196 = arith.divf %194, %195 : vector<8x128xf32>
    %197 = math.tanh %191 : vector<8x128xf32>
    %198 = vector.extract_strided_slice %196 {offsets = [0, 0], sizes = [8, 32], strides = [1, 1]} : vector<8x128xf32> to vector<8x32xf32>
    %199 = vector.extract_strided_slice %196 {offsets = [0, 32], sizes = [8, 32], strides = [1, 1]} : vector<8x128xf32> to vector<8x32xf32>
    %200 = vector.extract_strided_slice %197 {offsets = [0, 64], sizes = [8, 32], strides = [1, 1]} : vector<8x128xf32> to vector<8x32xf32>
    %201 = vector.extract_strided_slice %196 {offsets = [0, 96], sizes = [8, 32], strides = [1, 1]} : vector<8x128xf32> to vector<8x32xf32>
    %202 = arith.mulf %199, %189 : vector<8x32xf32>
    %203 = arith.mulf %198, %200 : vector<8x32xf32>
    %204 = arith.addf %202, %203 : vector<8x32xf32>
    %205 = math.tanh %204 : vector<8x32xf32>
    %206 = arith.mulf %201, %205 : vector<8x32xf32>
    %cst_49 = arith.constant 0.000000e+00 : f32
    %207 = vector.broadcast %cst_49 : f32 to vector<8x32xf32>
    %208 = arith.maximumf %206, %207 : vector<8x32xf32>
    %209 = vector.broadcast %186 : vector<1x32xf32> to vector<8x32xf32>
    %210 = arith.mulf %208, %209 : vector<8x32xf32>
    %cst_50 = arith.constant dense<0.000000e+00> : vector<8xf32>
    %211 = vector.multi_reduction <add>, %210, %cst_50 [1] : vector<8x32xf32> to vector<8xf32>
    %212 = vector.shape_cast %211 : vector<8xf32> to vector<8x1xf32>
    %213 = vector.broadcast %187 : vector<1x1xf32> to vector<8x1xf32>
    %214 = arith.addf %212, %213 : vector<8x1xf32>
    %c0_51 = arith.constant 0 : index
    %c0_52 = arith.constant 0 : index
    %215 = vector.load %arg13[%c0_51, %c0_52] : memref<8x12xf32, #tpu.memory_space<vmem>>, vector<8x1xf32>
    tpu.vector_store %arg13[%c0_51, %c0_52], %214 {strides = array<i32>} : memref<8x12xf32, #tpu.memory_space<vmem>>, vector<8x1xf32>,
    %cst_53 = arith.constant dense<0.000000e+00> : vector<8x128xf32>
    %216 = tpu.matmul %206, %185, %cst_53 {dimension_numbers = #tpu.dot_dimension_numbers<[1], [0], [0], [1], [0, 0, 1, 1], [], []>} : vector<8x32xf32>, vector<32x128xf32>, vector<8x128xf32> -> vector<8x128xf32>
    %217 = arith.addf %184, %216 : vector<8x128xf32>
    %218 = arith.negf %217 : vector<8x128xf32>
    %219 = math.exp %218 : vector<8x128xf32>
    %cst_54 = arith.constant 1.000000e+00 : f32
    %220 = vector.broadcast %cst_54 : f32 to vector<8x128xf32>
    %221 = arith.addf %220, %219 : vector<8x128xf32>
    %222 = arith.divf %220, %221 : vector<8x128xf32>
    %223 = math.tanh %217 : vector<8x128xf32>
    %224 = vector.extract_strided_slice %222 {offsets = [0, 0], sizes = [8, 32], strides = [1, 1]} : vector<8x128xf32> to vector<8x32xf32>
    %225 = vector.extract_strided_slice %222 {offsets = [0, 32], sizes = [8, 32], strides = [1, 1]} : vector<8x128xf32> to vector<8x32xf32>
    %226 = vector.extract_strided_slice %223 {offsets = [0, 64], sizes = [8, 32], strides = [1, 1]} : vector<8x128xf32> to vector<8x32xf32>
    %227 = vector.extract_strided_slice %222 {offsets = [0, 96], sizes = [8, 32], strides = [1, 1]} : vector<8x128xf32> to vector<8x32xf32>
    %228 = arith.mulf %225, %204 : vector<8x32xf32>
    %229 = arith.mulf %224, %226 : vector<8x32xf32>
    %230 = arith.addf %228, %229 : vector<8x32xf32>
    %231 = math.tanh %230 : vector<8x32xf32>
    %232 = arith.mulf %227, %231 : vector<8x32xf32>
    %cst_55 = arith.constant 0.000000e+00 : f32
    %233 = vector.broadcast %cst_55 : f32 to vector<8x32xf32>
    %234 = arith.maximumf %232, %233 : vector<8x32xf32>
    %235 = vector.broadcast %186 : vector<1x32xf32> to vector<8x32xf32>
    %236 = arith.mulf %234, %235 : vector<8x32xf32>
    %cst_56 = arith.constant dense<0.000000e+00> : vector<8xf32>
    %237 = vector.multi_reduction <add>, %236, %cst_56 [1] : vector<8x32xf32> to vector<8xf32>
    %238 = vector.shape_cast %237 : vector<8xf32> to vector<8x1xf32>
    %239 = vector.broadcast %187 : vector<1x1xf32> to vector<8x1xf32>
    %240 = arith.addf %238, %239 : vector<8x1xf32>
    %c0_57 = arith.constant 0 : index
    %c1 = arith.constant 1 : index
    %241 = vector.load %arg13[%c0_57, %c1] : memref<8x12xf32, #tpu.memory_space<vmem>>, vector<8x1xf32>
    tpu.vector_store %arg13[%c0_57, %c1], %240 {strides = array<i32>} : memref<8x12xf32, #tpu.memory_space<vmem>>, vector<8x1xf32>,
    %cst_58 = arith.constant dense<0.000000e+00> : vector<8x128xf32>
    %242 = tpu.matmul %232, %185, %cst_58 {dimension_numbers = #tpu.dot_dimension_numbers<[1], [0], [0], [1], [0, 0, 1, 1], [], []>} : vector<8x32xf32>, vector<32x128xf32>, vector<8x128xf32> -> vector<8x128xf32>
    %243 = arith.addf %184, %242 : vector<8x128xf32>
    %244 = arith.negf %243 : vector<8x128xf32>
    %245 = math.exp %244 : vector<8x128xf32>
    %cst_59 = arith.constant 1.000000e+00 : f32
    %246 = vector.broadcast %cst_59 : f32 to vector<8x128xf32>
    %247 = arith.addf %246, %245 : vector<8x128xf32>
    %248 = arith.divf %246, %247 : vector<8x128xf32>
    %249 = math.tanh %243 : vector<8x128xf32>
    %250 = vector.extract_strided_slice %248 {offsets = [0, 0], sizes = [8, 32], strides = [1, 1]} : vector<8x128xf32> to vector<8x32xf32>
    %251 = vector.extract_strided_slice %248 {offsets = [0, 32], sizes = [8, 32], strides = [1, 1]} : vector<8x128xf32> to vector<8x32xf32>
    %252 = vector.extract_strided_slice %249 {offsets = [0, 64], sizes = [8, 32], strides = [1, 1]} : vector<8x128xf32> to vector<8x32xf32>
    %253 = vector.extract_strided_slice %248 {offsets = [0, 96], sizes = [8, 32], strides = [1, 1]} : vector<8x128xf32> to vector<8x32xf32>
    %254 = arith.mulf %251, %230 : vector<8x32xf32>
    %255 = arith.mulf %250, %252 : vector<8x32xf32>
    %256 = arith.addf %254, %255 : vector<8x32xf32>
    %257 = math.tanh %256 : vector<8x32xf32>
    %258 = arith.mulf %253, %257 : vector<8x32xf32>
    %cst_60 = arith.constant 0.000000e+00 : f32
    %259 = vector.broadcast %cst_60 : f32 to vector<8x32xf32>
    %260 = arith.maximumf %258, %259 : vector<8x32xf32>
    %261 = vector.broadcast %186 : vector<1x32xf32> to vector<8x32xf32>
    %262 = arith.mulf %260, %261 : vector<8x32xf32>
    %cst_61 = arith.constant dense<0.000000e+00> : vector<8xf32>
    %263 = vector.multi_reduction <add>, %262, %cst_61 [1] : vector<8x32xf32> to vector<8xf32>
    %264 = vector.shape_cast %263 : vector<8xf32> to vector<8x1xf32>
    %265 = vector.broadcast %187 : vector<1x1xf32> to vector<8x1xf32>
    %266 = arith.addf %264, %265 : vector<8x1xf32>
    %c0_62 = arith.constant 0 : index
    %c2 = arith.constant 2 : index
    %267 = vector.load %arg13[%c0_62, %c2] : memref<8x12xf32, #tpu.memory_space<vmem>>, vector<8x1xf32>
    tpu.vector_store %arg13[%c0_62, %c2], %266 {strides = array<i32>} : memref<8x12xf32, #tpu.memory_space<vmem>>, vector<8x1xf32>,
    %cst_63 = arith.constant dense<0.000000e+00> : vector<8x128xf32>
    %268 = tpu.matmul %258, %185, %cst_63 {dimension_numbers = #tpu.dot_dimension_numbers<[1], [0], [0], [1], [0, 0, 1, 1], [], []>} : vector<8x32xf32>, vector<32x128xf32>, vector<8x128xf32> -> vector<8x128xf32>
    %269 = arith.addf %184, %268 : vector<8x128xf32>
    %270 = arith.negf %269 : vector<8x128xf32>
    %271 = math.exp %270 : vector<8x128xf32>
    %cst_64 = arith.constant 1.000000e+00 : f32
    %272 = vector.broadcast %cst_64 : f32 to vector<8x128xf32>
    %273 = arith.addf %272, %271 : vector<8x128xf32>
    %274 = arith.divf %272, %273 : vector<8x128xf32>
    %275 = math.tanh %269 : vector<8x128xf32>
    %276 = vector.extract_strided_slice %274 {offsets = [0, 0], sizes = [8, 32], strides = [1, 1]} : vector<8x128xf32> to vector<8x32xf32>
    %277 = vector.extract_strided_slice %274 {offsets = [0, 32], sizes = [8, 32], strides = [1, 1]} : vector<8x128xf32> to vector<8x32xf32>
    %278 = vector.extract_strided_slice %275 {offsets = [0, 64], sizes = [8, 32], strides = [1, 1]} : vector<8x128xf32> to vector<8x32xf32>
    %279 = vector.extract_strided_slice %274 {offsets = [0, 96], sizes = [8, 32], strides = [1, 1]} : vector<8x128xf32> to vector<8x32xf32>
    %280 = arith.mulf %277, %256 : vector<8x32xf32>
    %281 = arith.mulf %276, %278 : vector<8x32xf32>
    %282 = arith.addf %280, %281 : vector<8x32xf32>
    %283 = math.tanh %282 : vector<8x32xf32>
    %284 = arith.mulf %279, %283 : vector<8x32xf32>
    %cst_65 = arith.constant 0.000000e+00 : f32
    %285 = vector.broadcast %cst_65 : f32 to vector<8x32xf32>
    %286 = arith.maximumf %284, %285 : vector<8x32xf32>
    %287 = vector.broadcast %186 : vector<1x32xf32> to vector<8x32xf32>
    %288 = arith.mulf %286, %287 : vector<8x32xf32>
    %cst_66 = arith.constant dense<0.000000e+00> : vector<8xf32>
    %289 = vector.multi_reduction <add>, %288, %cst_66 [1] : vector<8x32xf32> to vector<8xf32>
    %290 = vector.shape_cast %289 : vector<8xf32> to vector<8x1xf32>
    %291 = vector.broadcast %187 : vector<1x1xf32> to vector<8x1xf32>
    %292 = arith.addf %290, %291 : vector<8x1xf32>
    %c0_67 = arith.constant 0 : index
    %c3 = arith.constant 3 : index
    %293 = vector.load %arg13[%c0_67, %c3] : memref<8x12xf32, #tpu.memory_space<vmem>>, vector<8x1xf32>
    tpu.vector_store %arg13[%c0_67, %c3], %292 {strides = array<i32>} : memref<8x12xf32, #tpu.memory_space<vmem>>, vector<8x1xf32>,
    %cst_68 = arith.constant dense<0.000000e+00> : vector<8x128xf32>
    %294 = tpu.matmul %284, %185, %cst_68 {dimension_numbers = #tpu.dot_dimension_numbers<[1], [0], [0], [1], [0, 0, 1, 1], [], []>} : vector<8x32xf32>, vector<32x128xf32>, vector<8x128xf32> -> vector<8x128xf32>
    %295 = arith.addf %184, %294 : vector<8x128xf32>
    %296 = arith.negf %295 : vector<8x128xf32>
    %297 = math.exp %296 : vector<8x128xf32>
    %cst_69 = arith.constant 1.000000e+00 : f32
    %298 = vector.broadcast %cst_69 : f32 to vector<8x128xf32>
    %299 = arith.addf %298, %297 : vector<8x128xf32>
    %300 = arith.divf %298, %299 : vector<8x128xf32>
    %301 = math.tanh %295 : vector<8x128xf32>
    %302 = vector.extract_strided_slice %300 {offsets = [0, 0], sizes = [8, 32], strides = [1, 1]} : vector<8x128xf32> to vector<8x32xf32>
    %303 = vector.extract_strided_slice %300 {offsets = [0, 32], sizes = [8, 32], strides = [1, 1]} : vector<8x128xf32> to vector<8x32xf32>
    %304 = vector.extract_strided_slice %301 {offsets = [0, 64], sizes = [8, 32], strides = [1, 1]} : vector<8x128xf32> to vector<8x32xf32>
    %305 = vector.extract_strided_slice %300 {offsets = [0, 96], sizes = [8, 32], strides = [1, 1]} : vector<8x128xf32> to vector<8x32xf32>
    %306 = arith.mulf %303, %282 : vector<8x32xf32>
    %307 = arith.mulf %302, %304 : vector<8x32xf32>
    %308 = arith.addf %306, %307 : vector<8x32xf32>
    %309 = math.tanh %308 : vector<8x32xf32>
    %310 = arith.mulf %305, %309 : vector<8x32xf32>
    %cst_70 = arith.constant 0.000000e+00 : f32
    %311 = vector.broadcast %cst_70 : f32 to vector<8x32xf32>
    %312 = arith.maximumf %310, %311 : vector<8x32xf32>
    %313 = vector.broadcast %186 : vector<1x32xf32> to vector<8x32xf32>
    %314 = arith.mulf %312, %313 : vector<8x32xf32>
    %cst_71 = arith.constant dense<0.000000e+00> : vector<8xf32>
    %315 = vector.multi_reduction <add>, %314, %cst_71 [1] : vector<8x32xf32> to vector<8xf32>
    %316 = vector.shape_cast %315 : vector<8xf32> to vector<8x1xf32>
    %317 = vector.broadcast %187 : vector<1x1xf32> to vector<8x1xf32>
    %318 = arith.addf %316, %317 : vector<8x1xf32>
    %c0_72 = arith.constant 0 : index
    %c4 = arith.constant 4 : index
    %319 = vector.load %arg13[%c0_72, %c4] : memref<8x12xf32, #tpu.memory_space<vmem>>, vector<8x1xf32>
    tpu.vector_store %arg13[%c0_72, %c4], %318 {strides = array<i32>} : memref<8x12xf32, #tpu.memory_space<vmem>>, vector<8x1xf32>,
    %cst_73 = arith.constant dense<0.000000e+00> : vector<8x128xf32>
    %320 = tpu.matmul %310, %185, %cst_73 {dimension_numbers = #tpu.dot_dimension_numbers<[1], [0], [0], [1], [0, 0, 1, 1], [], []>} : vector<8x32xf32>, vector<32x128xf32>, vector<8x128xf32> -> vector<8x128xf32>
    %321 = arith.addf %184, %320 : vector<8x128xf32>
    %322 = arith.negf %321 : vector<8x128xf32>
    %323 = math.exp %322 : vector<8x128xf32>
    %cst_74 = arith.constant 1.000000e+00 : f32
    %324 = vector.broadcast %cst_74 : f32 to vector<8x128xf32>
    %325 = arith.addf %324, %323 : vector<8x128xf32>
    %326 = arith.divf %324, %325 : vector<8x128xf32>
    %327 = math.tanh %321 : vector<8x128xf32>
    %328 = vector.extract_strided_slice %326 {offsets = [0, 0], sizes = [8, 32], strides = [1, 1]} : vector<8x128xf32> to vector<8x32xf32>
    %329 = vector.extract_strided_slice %326 {offsets = [0, 32], sizes = [8, 32], strides = [1, 1]} : vector<8x128xf32> to vector<8x32xf32>
    %330 = vector.extract_strided_slice %327 {offsets = [0, 64], sizes = [8, 32], strides = [1, 1]} : vector<8x128xf32> to vector<8x32xf32>
    %331 = vector.extract_strided_slice %326 {offsets = [0, 96], sizes = [8, 32], strides = [1, 1]} : vector<8x128xf32> to vector<8x32xf32>
    %332 = arith.mulf %329, %308 : vector<8x32xf32>
    %333 = arith.mulf %328, %330 : vector<8x32xf32>
    %334 = arith.addf %332, %333 : vector<8x32xf32>
    %335 = math.tanh %334 : vector<8x32xf32>
    %336 = arith.mulf %331, %335 : vector<8x32xf32>
    %cst_75 = arith.constant 0.000000e+00 : f32
    %337 = vector.broadcast %cst_75 : f32 to vector<8x32xf32>
    %338 = arith.maximumf %336, %337 : vector<8x32xf32>
    %339 = vector.broadcast %186 : vector<1x32xf32> to vector<8x32xf32>
    %340 = arith.mulf %338, %339 : vector<8x32xf32>
    %cst_76 = arith.constant dense<0.000000e+00> : vector<8xf32>
    %341 = vector.multi_reduction <add>, %340, %cst_76 [1] : vector<8x32xf32> to vector<8xf32>
    %342 = vector.shape_cast %341 : vector<8xf32> to vector<8x1xf32>
    %343 = vector.broadcast %187 : vector<1x1xf32> to vector<8x1xf32>
    %344 = arith.addf %342, %343 : vector<8x1xf32>
    %c0_77 = arith.constant 0 : index
    %c5 = arith.constant 5 : index
    %345 = vector.load %arg13[%c0_77, %c5] : memref<8x12xf32, #tpu.memory_space<vmem>>, vector<8x1xf32>
    tpu.vector_store %arg13[%c0_77, %c5], %344 {strides = array<i32>} : memref<8x12xf32, #tpu.memory_space<vmem>>, vector<8x1xf32>,
    %cst_78 = arith.constant dense<0.000000e+00> : vector<8x128xf32>
    %346 = tpu.matmul %336, %185, %cst_78 {dimension_numbers = #tpu.dot_dimension_numbers<[1], [0], [0], [1], [0, 0, 1, 1], [], []>} : vector<8x32xf32>, vector<32x128xf32>, vector<8x128xf32> -> vector<8x128xf32>
    %347 = arith.addf %184, %346 : vector<8x128xf32>
    %348 = arith.negf %347 : vector<8x128xf32>
    %349 = math.exp %348 : vector<8x128xf32>
    %cst_79 = arith.constant 1.000000e+00 : f32
    %350 = vector.broadcast %cst_79 : f32 to vector<8x128xf32>
    %351 = arith.addf %350, %349 : vector<8x128xf32>
    %352 = arith.divf %350, %351 : vector<8x128xf32>
    %353 = math.tanh %347 : vector<8x128xf32>
    %354 = vector.extract_strided_slice %352 {offsets = [0, 0], sizes = [8, 32], strides = [1, 1]} : vector<8x128xf32> to vector<8x32xf32>
    %355 = vector.extract_strided_slice %352 {offsets = [0, 32], sizes = [8, 32], strides = [1, 1]} : vector<8x128xf32> to vector<8x32xf32>
    %356 = vector.extract_strided_slice %353 {offsets = [0, 64], sizes = [8, 32], strides = [1, 1]} : vector<8x128xf32> to vector<8x32xf32>
    %357 = vector.extract_strided_slice %352 {offsets = [0, 96], sizes = [8, 32], strides = [1, 1]} : vector<8x128xf32> to vector<8x32xf32>
    %358 = arith.mulf %355, %334 : vector<8x32xf32>
    %359 = arith.mulf %354, %356 : vector<8x32xf32>
    %360 = arith.addf %358, %359 : vector<8x32xf32>
    %361 = math.tanh %360 : vector<8x32xf32>
    %362 = arith.mulf %357, %361 : vector<8x32xf32>
    %cst_80 = arith.constant 0.000000e+00 : f32
    %363 = vector.broadcast %cst_80 : f32 to vector<8x32xf32>
    %364 = arith.maximumf %362, %363 : vector<8x32xf32>
    %365 = vector.broadcast %186 : vector<1x32xf32> to vector<8x32xf32>
    %366 = arith.mulf %364, %365 : vector<8x32xf32>
    %cst_81 = arith.constant dense<0.000000e+00> : vector<8xf32>
    %367 = vector.multi_reduction <add>, %366, %cst_81 [1] : vector<8x32xf32> to vector<8xf32>
    %368 = vector.shape_cast %367 : vector<8xf32> to vector<8x1xf32>
    %369 = vector.broadcast %187 : vector<1x1xf32> to vector<8x1xf32>
    %370 = arith.addf %368, %369 : vector<8x1xf32>
    %c0_82 = arith.constant 0 : index
    %c6 = arith.constant 6 : index
    %371 = vector.load %arg13[%c0_82, %c6] : memref<8x12xf32, #tpu.memory_space<vmem>>, vector<8x1xf32>
    tpu.vector_store %arg13[%c0_82, %c6], %370 {strides = array<i32>} : memref<8x12xf32, #tpu.memory_space<vmem>>, vector<8x1xf32>,
    %cst_83 = arith.constant dense<0.000000e+00> : vector<8x128xf32>
    %372 = tpu.matmul %362, %185, %cst_83 {dimension_numbers = #tpu.dot_dimension_numbers<[1], [0], [0], [1], [0, 0, 1, 1], [], []>} : vector<8x32xf32>, vector<32x128xf32>, vector<8x128xf32> -> vector<8x128xf32>
    %373 = arith.addf %184, %372 : vector<8x128xf32>
    %374 = arith.negf %373 : vector<8x128xf32>
    %375 = math.exp %374 : vector<8x128xf32>
    %cst_84 = arith.constant 1.000000e+00 : f32
    %376 = vector.broadcast %cst_84 : f32 to vector<8x128xf32>
    %377 = arith.addf %376, %375 : vector<8x128xf32>
    %378 = arith.divf %376, %377 : vector<8x128xf32>
    %379 = math.tanh %373 : vector<8x128xf32>
    %380 = vector.extract_strided_slice %378 {offsets = [0, 0], sizes = [8, 32], strides = [1, 1]} : vector<8x128xf32> to vector<8x32xf32>
    %381 = vector.extract_strided_slice %378 {offsets = [0, 32], sizes = [8, 32], strides = [1, 1]} : vector<8x128xf32> to vector<8x32xf32>
    %382 = vector.extract_strided_slice %379 {offsets = [0, 64], sizes = [8, 32], strides = [1, 1]} : vector<8x128xf32> to vector<8x32xf32>
    %383 = vector.extract_strided_slice %378 {offsets = [0, 96], sizes = [8, 32], strides = [1, 1]} : vector<8x128xf32> to vector<8x32xf32>
    %384 = arith.mulf %381, %360 : vector<8x32xf32>
    %385 = arith.mulf %380, %382 : vector<8x32xf32>
    %386 = arith.addf %384, %385 : vector<8x32xf32>
    %387 = math.tanh %386 : vector<8x32xf32>
    %388 = arith.mulf %383, %387 : vector<8x32xf32>
    %cst_85 = arith.constant 0.000000e+00 : f32
    %389 = vector.broadcast %cst_85 : f32 to vector<8x32xf32>
    %390 = arith.maximumf %388, %389 : vector<8x32xf32>
    %391 = vector.broadcast %186 : vector<1x32xf32> to vector<8x32xf32>
    %392 = arith.mulf %390, %391 : vector<8x32xf32>
    %cst_86 = arith.constant dense<0.000000e+00> : vector<8xf32>
    %393 = vector.multi_reduction <add>, %392, %cst_86 [1] : vector<8x32xf32> to vector<8xf32>
    %394 = vector.shape_cast %393 : vector<8xf32> to vector<8x1xf32>
    %395 = vector.broadcast %187 : vector<1x1xf32> to vector<8x1xf32>
    %396 = arith.addf %394, %395 : vector<8x1xf32>
    %c0_87 = arith.constant 0 : index
    %c7 = arith.constant 7 : index
    %397 = vector.load %arg13[%c0_87, %c7] : memref<8x12xf32, #tpu.memory_space<vmem>>, vector<8x1xf32>
    tpu.vector_store %arg13[%c0_87, %c7], %396 {strides = array<i32>} : memref<8x12xf32, #tpu.memory_space<vmem>>, vector<8x1xf32>,
    %cst_88 = arith.constant dense<0.000000e+00> : vector<8x128xf32>
    %398 = tpu.matmul %388, %185, %cst_88 {dimension_numbers = #tpu.dot_dimension_numbers<[1], [0], [0], [1], [0, 0, 1, 1], [], []>} : vector<8x32xf32>, vector<32x128xf32>, vector<8x128xf32> -> vector<8x128xf32>
    %399 = arith.addf %184, %398 : vector<8x128xf32>
    %400 = arith.negf %399 : vector<8x128xf32>
    %401 = math.exp %400 : vector<8x128xf32>
    %cst_89 = arith.constant 1.000000e+00 : f32
    %402 = vector.broadcast %cst_89 : f32 to vector<8x128xf32>
    %403 = arith.addf %402, %401 : vector<8x128xf32>
    %404 = arith.divf %402, %403 : vector<8x128xf32>
    %405 = math.tanh %399 : vector<8x128xf32>
    %406 = vector.extract_strided_slice %404 {offsets = [0, 0], sizes = [8, 32], strides = [1, 1]} : vector<8x128xf32> to vector<8x32xf32>
    %407 = vector.extract_strided_slice %404 {offsets = [0, 32], sizes = [8, 32], strides = [1, 1]} : vector<8x128xf32> to vector<8x32xf32>
    %408 = vector.extract_strided_slice %405 {offsets = [0, 64], sizes = [8, 32], strides = [1, 1]} : vector<8x128xf32> to vector<8x32xf32>
    %409 = vector.extract_strided_slice %404 {offsets = [0, 96], sizes = [8, 32], strides = [1, 1]} : vector<8x128xf32> to vector<8x32xf32>
    %410 = arith.mulf %407, %386 : vector<8x32xf32>
    %411 = arith.mulf %406, %408 : vector<8x32xf32>
    %412 = arith.addf %410, %411 : vector<8x32xf32>
    %413 = math.tanh %412 : vector<8x32xf32>
    %414 = arith.mulf %409, %413 : vector<8x32xf32>
    %cst_90 = arith.constant 0.000000e+00 : f32
    %415 = vector.broadcast %cst_90 : f32 to vector<8x32xf32>
    %416 = arith.maximumf %414, %415 : vector<8x32xf32>
    %417 = vector.broadcast %186 : vector<1x32xf32> to vector<8x32xf32>
    %418 = arith.mulf %416, %417 : vector<8x32xf32>
    %cst_91 = arith.constant dense<0.000000e+00> : vector<8xf32>
    %419 = vector.multi_reduction <add>, %418, %cst_91 [1] : vector<8x32xf32> to vector<8xf32>
    %420 = vector.shape_cast %419 : vector<8xf32> to vector<8x1xf32>
    %421 = vector.broadcast %187 : vector<1x1xf32> to vector<8x1xf32>
    %422 = arith.addf %420, %421 : vector<8x1xf32>
    %c0_92 = arith.constant 0 : index
    %c8 = arith.constant 8 : index
    %423 = vector.load %arg13[%c0_92, %c8] : memref<8x12xf32, #tpu.memory_space<vmem>>, vector<8x1xf32>
    tpu.vector_store %arg13[%c0_92, %c8], %422 {strides = array<i32>} : memref<8x12xf32, #tpu.memory_space<vmem>>, vector<8x1xf32>,
    %cst_93 = arith.constant dense<0.000000e+00> : vector<8x128xf32>
    %424 = tpu.matmul %414, %185, %cst_93 {dimension_numbers = #tpu.dot_dimension_numbers<[1], [0], [0], [1], [0, 0, 1, 1], [], []>} : vector<8x32xf32>, vector<32x128xf32>, vector<8x128xf32> -> vector<8x128xf32>
    %425 = arith.addf %184, %424 : vector<8x128xf32>
    %426 = arith.negf %425 : vector<8x128xf32>
    %427 = math.exp %426 : vector<8x128xf32>
    %cst_94 = arith.constant 1.000000e+00 : f32
    %428 = vector.broadcast %cst_94 : f32 to vector<8x128xf32>
    %429 = arith.addf %428, %427 : vector<8x128xf32>
    %430 = arith.divf %428, %429 : vector<8x128xf32>
    %431 = math.tanh %425 : vector<8x128xf32>
    %432 = vector.extract_strided_slice %430 {offsets = [0, 0], sizes = [8, 32], strides = [1, 1]} : vector<8x128xf32> to vector<8x32xf32>
    %433 = vector.extract_strided_slice %430 {offsets = [0, 32], sizes = [8, 32], strides = [1, 1]} : vector<8x128xf32> to vector<8x32xf32>
    %434 = vector.extract_strided_slice %431 {offsets = [0, 64], sizes = [8, 32], strides = [1, 1]} : vector<8x128xf32> to vector<8x32xf32>
    %435 = vector.extract_strided_slice %430 {offsets = [0, 96], sizes = [8, 32], strides = [1, 1]} : vector<8x128xf32> to vector<8x32xf32>
    %436 = arith.mulf %433, %412 : vector<8x32xf32>
    %437 = arith.mulf %432, %434 : vector<8x32xf32>
    %438 = arith.addf %436, %437 : vector<8x32xf32>
    %439 = math.tanh %438 : vector<8x32xf32>
    %440 = arith.mulf %435, %439 : vector<8x32xf32>
    %cst_95 = arith.constant 0.000000e+00 : f32
    %441 = vector.broadcast %cst_95 : f32 to vector<8x32xf32>
    %442 = arith.maximumf %440, %441 : vector<8x32xf32>
    %443 = vector.broadcast %186 : vector<1x32xf32> to vector<8x32xf32>
    %444 = arith.mulf %442, %443 : vector<8x32xf32>
    %cst_96 = arith.constant dense<0.000000e+00> : vector<8xf32>
    %445 = vector.multi_reduction <add>, %444, %cst_96 [1] : vector<8x32xf32> to vector<8xf32>
    %446 = vector.shape_cast %445 : vector<8xf32> to vector<8x1xf32>
    %447 = vector.broadcast %187 : vector<1x1xf32> to vector<8x1xf32>
    %448 = arith.addf %446, %447 : vector<8x1xf32>
    %c0_97 = arith.constant 0 : index
    %c9 = arith.constant 9 : index
    %449 = vector.load %arg13[%c0_97, %c9] : memref<8x12xf32, #tpu.memory_space<vmem>>, vector<8x1xf32>
    tpu.vector_store %arg13[%c0_97, %c9], %448 {strides = array<i32>} : memref<8x12xf32, #tpu.memory_space<vmem>>, vector<8x1xf32>,
    %cst_98 = arith.constant dense<0.000000e+00> : vector<8x128xf32>
    %450 = tpu.matmul %440, %185, %cst_98 {dimension_numbers = #tpu.dot_dimension_numbers<[1], [0], [0], [1], [0, 0, 1, 1], [], []>} : vector<8x32xf32>, vector<32x128xf32>, vector<8x128xf32> -> vector<8x128xf32>
    %451 = arith.addf %184, %450 : vector<8x128xf32>
    %452 = arith.negf %451 : vector<8x128xf32>
    %453 = math.exp %452 : vector<8x128xf32>
    %cst_99 = arith.constant 1.000000e+00 : f32
    %454 = vector.broadcast %cst_99 : f32 to vector<8x128xf32>
    %455 = arith.addf %454, %453 : vector<8x128xf32>
    %456 = arith.divf %454, %455 : vector<8x128xf32>
    %457 = math.tanh %451 : vector<8x128xf32>
    %458 = vector.extract_strided_slice %456 {offsets = [0, 0], sizes = [8, 32], strides = [1, 1]} : vector<8x128xf32> to vector<8x32xf32>
    %459 = vector.extract_strided_slice %456 {offsets = [0, 32], sizes = [8, 32], strides = [1, 1]} : vector<8x128xf32> to vector<8x32xf32>
    %460 = vector.extract_strided_slice %457 {offsets = [0, 64], sizes = [8, 32], strides = [1, 1]} : vector<8x128xf32> to vector<8x32xf32>
    %461 = vector.extract_strided_slice %456 {offsets = [0, 96], sizes = [8, 32], strides = [1, 1]} : vector<8x128xf32> to vector<8x32xf32>
    %462 = arith.mulf %459, %438 : vector<8x32xf32>
    %463 = arith.mulf %458, %460 : vector<8x32xf32>
    %464 = arith.addf %462, %463 : vector<8x32xf32>
    %465 = math.tanh %464 : vector<8x32xf32>
    %466 = arith.mulf %461, %465 : vector<8x32xf32>
    %cst_100 = arith.constant 0.000000e+00 : f32
    %467 = vector.broadcast %cst_100 : f32 to vector<8x32xf32>
    %468 = arith.maximumf %466, %467 : vector<8x32xf32>
    %469 = vector.broadcast %186 : vector<1x32xf32> to vector<8x32xf32>
    %470 = arith.mulf %468, %469 : vector<8x32xf32>
    %cst_101 = arith.constant dense<0.000000e+00> : vector<8xf32>
    %471 = vector.multi_reduction <add>, %470, %cst_101 [1] : vector<8x32xf32> to vector<8xf32>
    %472 = vector.shape_cast %471 : vector<8xf32> to vector<8x1xf32>
    %473 = vector.broadcast %187 : vector<1x1xf32> to vector<8x1xf32>
    %474 = arith.addf %472, %473 : vector<8x1xf32>
    %c0_102 = arith.constant 0 : index
    %c10 = arith.constant 10 : index
    %475 = vector.load %arg13[%c0_102, %c10] : memref<8x12xf32, #tpu.memory_space<vmem>>, vector<8x1xf32>
    tpu.vector_store %arg13[%c0_102, %c10], %474 {strides = array<i32>} : memref<8x12xf32, #tpu.memory_space<vmem>>, vector<8x1xf32>,
    %cst_103 = arith.constant dense<0.000000e+00> : vector<8x128xf32>
    %476 = tpu.matmul %466, %185, %cst_103 {dimension_numbers = #tpu.dot_dimension_numbers<[1], [0], [0], [1], [0, 0, 1, 1], [], []>} : vector<8x32xf32>, vector<32x128xf32>, vector<8x128xf32> -> vector<8x128xf32>
    %477 = arith.addf %184, %476 : vector<8x128xf32>
    %478 = arith.negf %477 : vector<8x128xf32>
    %479 = math.exp %478 : vector<8x128xf32>
    %cst_104 = arith.constant 1.000000e+00 : f32
    %480 = vector.broadcast %cst_104 : f32 to vector<8x128xf32>
    %481 = arith.addf %480, %479 : vector<8x128xf32>
    %482 = arith.divf %480, %481 : vector<8x128xf32>
    %483 = math.tanh %477 : vector<8x128xf32>
    %484 = vector.extract_strided_slice %482 {offsets = [0, 0], sizes = [8, 32], strides = [1, 1]} : vector<8x128xf32> to vector<8x32xf32>
    %485 = vector.extract_strided_slice %482 {offsets = [0, 32], sizes = [8, 32], strides = [1, 1]} : vector<8x128xf32> to vector<8x32xf32>
    %486 = vector.extract_strided_slice %483 {offsets = [0, 64], sizes = [8, 32], strides = [1, 1]} : vector<8x128xf32> to vector<8x32xf32>
    %487 = vector.extract_strided_slice %482 {offsets = [0, 96], sizes = [8, 32], strides = [1, 1]} : vector<8x128xf32> to vector<8x32xf32>
    %488 = arith.mulf %485, %464 : vector<8x32xf32>
    %489 = arith.mulf %484, %486 : vector<8x32xf32>
    %490 = arith.addf %488, %489 : vector<8x32xf32>
    %491 = math.tanh %490 : vector<8x32xf32>
    %492 = arith.mulf %487, %491 : vector<8x32xf32>
    %cst_105 = arith.constant 0.000000e+00 : f32
    %493 = vector.broadcast %cst_105 : f32 to vector<8x32xf32>
    %494 = arith.maximumf %492, %493 : vector<8x32xf32>
    %495 = vector.broadcast %186 : vector<1x32xf32> to vector<8x32xf32>
    %496 = arith.mulf %494, %495 : vector<8x32xf32>
    %cst_106 = arith.constant dense<0.000000e+00> : vector<8xf32>
    %497 = vector.multi_reduction <add>, %496, %cst_106 [1] : vector<8x32xf32> to vector<8xf32>
    %498 = vector.shape_cast %497 : vector<8xf32> to vector<8x1xf32>
    %499 = vector.broadcast %187 : vector<1x1xf32> to vector<8x1xf32>
    %500 = arith.addf %498, %499 : vector<8x1xf32>
    %c0_107 = arith.constant 0 : index
    %c11 = arith.constant 11 : index
    %501 = vector.load %arg13[%c0_107, %c11] : memref<8x12xf32, #tpu.memory_space<vmem>>, vector<8x1xf32>
    tpu.vector_store %arg13[%c0_107, %c11], %500 {strides = array<i32>} : memref<8x12xf32, #tpu.memory_space<vmem>>, vector<8x1xf32>,
    return
  }
  func.func @transform_0(%arg0: i32) -> (i32, i32, i32) {
    %c0_i32 = arith.constant 0 : i32
    %c0_i32_0 = arith.constant 0 : i32
    %c0_i32_1 = arith.constant 0 : i32
    return %c0_i32, %arg0, %c0_i32_0 : i32, i32, i32
  }
  func.func @transform_1(%arg0: i32) -> (i32, i32) {
    %c0_i32 = arith.constant 0 : i32
    %c0_i32_0 = arith.constant 0 : i32
    return %arg0, %c0_i32 : i32, i32
  }
  func.func @transform_2(%arg0: i32) -> (i32, i32) {
    %c0_i32 = arith.constant 0 : i32
    %c0_i32_0 = arith.constant 0 : i32
    %c0_i32_1 = arith.constant 0 : i32
    return %c0_i32, %c0_i32_0 : i32, i32
  }
  func.func @transform_3(%arg0: i32) -> (i32, i32) {
    %c0_i32 = arith.constant 0 : i32
    %c0_i32_0 = arith.constant 0 : i32
    %c0_i32_1 = arith.constant 0 : i32
    return %c0_i32, %c0_i32_0 : i32, i32
  }
  func.func @transform_4(%arg0: i32) -> (i32, i32) {
    %c0_i32 = arith.constant 0 : i32
    %c0_i32_0 = arith.constant 0 : i32
    %c0_i32_1 = arith.constant 0 : i32
    return %c0_i32, %c0_i32_0 : i32, i32
  }
  func.func @transform_5(%arg0: i32) -> (i32, i32) {
    %c0_i32 = arith.constant 0 : i32
    %c0_i32_0 = arith.constant 0 : i32
    %c0_i32_1 = arith.constant 0 : i32
    return %c0_i32, %c0_i32_0 : i32, i32
  }
  func.func @transform_6(%arg0: i32) -> (i32, i32) {
    %c0_i32 = arith.constant 0 : i32
    %c0_i32_0 = arith.constant 0 : i32
    %c0_i32_1 = arith.constant 0 : i32
    return %c0_i32, %c0_i32_0 : i32, i32
  }
  func.func @transform_7(%arg0: i32) -> (i32, i32) {
    %c0_i32 = arith.constant 0 : i32
    %c0_i32_0 = arith.constant 0 : i32
    %c0_i32_1 = arith.constant 0 : i32
    return %c0_i32, %c0_i32_0 : i32, i32
  }
  func.func @transform_8(%arg0: i32) -> (i32, i32) {
    %c0_i32 = arith.constant 0 : i32
    %c0_i32_0 = arith.constant 0 : i32
    %c0_i32_1 = arith.constant 0 : i32
    return %c0_i32, %c0_i32_0 : i32, i32
  }
  func.func @transform_9(%arg0: i32) -> (i32, i32) {
    %c0_i32 = arith.constant 0 : i32
    %c0_i32_0 = arith.constant 0 : i32
    %c0_i32_1 = arith.constant 0 : i32
    return %c0_i32, %c0_i32_0 : i32, i32
  }
  func.func @transform_10(%arg0: i32) -> (i32, i32) {
    %c0_i32 = arith.constant 0 : i32
    %c0_i32_0 = arith.constant 0 : i32
    %c0_i32_1 = arith.constant 0 : i32
    return %c0_i32, %c0_i32_0 : i32, i32
  }
  func.func @transform_11(%arg0: i32) -> (i32, i32) {
    %c0_i32 = arith.constant 0 : i32
    %c0_i32_0 = arith.constant 0 : i32
    %c0_i32_1 = arith.constant 0 : i32
    return %c0_i32, %c0_i32_0 : i32, i32
  }
  func.func @transform_12(%arg0: i32) -> (i32, i32) {
    %c0_i32 = arith.constant 0 : i32
    %c0_i32_0 = arith.constant 0 : i32
    return %arg0, %c0_i32 : i32, i32
  }
}

</mosaic_0001>

<bundles_post_ra>
// kernel: tpu_custom_call.1
= control target key start
LH: loop header
LB: loop body
LE: loop exit
PB: predicated region body
PF: predicated region fallthrough
CT: control target
= control target key end

     0   :  { %s4025_s0 = inlined_call_operand.vmem [shape: f32[8,8,1], index: 0, kind: input, shape index: {}]   ;;  %s4026_s1 = inlined_call_operand.hbm [shape: f32[8,16], index: 1, kind: input, shape index: {}]   ;;  %s4027_s2 = inlined_call_operand.vmem [shape: f32[1,128], index: 2, kind: input, shape index: {}]   ;;  %s4028_s3 = inlined_call_operand.hbm [shape: f32[16,128], index: 3, kind: input, shape index: {}]   ;;  %s4029_s4 = inlined_call_operand.vmem [shape: f32[32,128], index: 4, kind: input, shape index: {}]   ;;  %s4030_s5 = inlined_call_operand.vmem [shape: f32[1,128], index: 5, kind: input, shape index: {}]   ;;  %s4031_s6 = inlined_call_operand.vmem [shape: f32[32,128], index: 6, kind: input, shape index: {}]   ;;  %s4032_s7 = inlined_call_operand.hbm [shape: f32[16,128], index: 7, kind: input, shape index: {}]   ;;  %s4033_s8 = inlined_call_operand.vmem [shape: f32[32,128], index: 8, kind: input, shape index: {}]   ;;  %s4034_s9 = inlined_call_operand.vmem [shape: f32[1,128], index: 9, kind: input, shape index: {}]   ;;  %s4035_s10 = inlined_call_operand.vmem [shape: f32[1,32], index: 10, kind: input, shape index: {}]   ;;  %s4036_s11 = inlined_call_operand.<no memory space> [shape: f32[1,1], index: 11, kind: input, shape index: {}]   ;;  %s4037_s12 = inlined_call_operand.hbm [shape: f32[8,12], index: 12, kind: output, shape index: {}]  }
   0x1   :  { %v17_v0 = vstv %s4036_s11 }
   0x2   :  { %18 = vst [vmem:[#allocation2] sm:$0x1] %v17_v0 }
   0x3   :  { %19 = vsyncpa [#allocation4], 0 }
   0x4   :  { %20 = vsyncpa [#allocation7], 0 }
   0x5   :  { %21 = vsyncpa [#allocation5], 0  ;;  %s3433_s23 = smov [#allocation6]   ;;  %s3339_s27 = scalar_lea.hbm %s4028_s3, 256 }
   0x6   :  { %s41_s24 = sshll.u32 %s3433_s23, 4  ;;  %p3340_p0 = scmp.ne.s32.totalorder %s4028_s3, %s3339_s27  ;;  %s42_s24 = int_to_ptr.vmem [resolvable:$true] %s41_s24 }
   0x7   :  { %p3343_p1 = scmp.lt.u32.totalorder %s3339_s27, %s4028_s3 }
   0x9   :  { %p3345_p2 = pnand %p3343_p1, %p3340_p0 }
   0xb   :  { %3348 = shalt.err (!%p3345_p2)
}
   0xc   :  { %s3349_s11 = scalar_lea.vmem %s42_s24, 256  ;;  %p3354_p4 = scmp.lt.s32.totalorder %s42_s24, %s42_s24 }
   0xd   :  { %p3350_p3 = scmp.ne.s32.totalorder %s42_s24, %s3349_s11  ;;  %p3355_p5 = scmp.lt.s32.totalorder %s3349_s11, %s3349_s11 }
   0xf   :  { %p3356_p6 = por %p3355_p5, %p3354_p4 }
  0x11   :  { %p3357_p7 = pnand %p3356_p6, %p3350_p3 }
  0x13   :  { %3360 = shalt.err (!%p3357_p7)
}
  0x14   :  { %s3434_s14 = smov 128   ;;  %s3435_s15 = smov 8  }
  0x15   :  { %47 = dma.hbm_to_vmem [thread:$0]  %s4028_s3, 256, %s42_s24, [#allocation7], %s3434_s14, %s3434_s14, %s3435_s15  }
  0x16   :  { %s3436_s18 = smov [#allocation3]   ;;  %s3437_s20 = smov [#allocation8]  }
  0x17   :  { %s30_s19 = sshll.u32 %s3436_s18, 4  ;;  %s59_s21 = sshll.u32 %s3437_s20, 4  ;;  %s31_s19 = int_to_ptr.vmem [resolvable:$true] %s30_s19  ;;  %s60_s21 = int_to_ptr.vmem [resolvable:$true] %s59_s21 }
  0x18   :  { %s3361_s25 = scalar_lea.hbm %s4026_s1, 128 }
  0x19   :  { %p3362_p8 = scmp.ne.s32.totalorder %s4026_s1, %s3361_s25  ;;  %p3365_p9 = scmp.lt.u32.totalorder %s3361_s25, %s4026_s1 }
  0x1b   :  { %p3367_p10 = pnand %p3365_p9, %p3362_p8 }
  0x1d   :  { %3370 = shalt.err (!%p3367_p10)
}
  0x1e   :  { %s3371_s3 = scalar_lea.vmem %s31_s19, 128  ;;  %p3376_p12 = scmp.lt.s32.totalorder %s31_s19, %s31_s19 }
  0x1f   :  { %p3372_p11 = scmp.ne.s32.totalorder %s31_s19, %s3371_s3  ;;  %p3377_p13 = scmp.lt.s32.totalorder %s3371_s3, %s3371_s3 }
  0x21   :  { %p3378_p0 = por %p3377_p13, %p3376_p12 }
  0x23   :  { %p3379_p1 = pnand %p3378_p0, %p3372_p11 }
  0x25   :  { %3382 = shalt.err (!%p3379_p1)
}
  0x26   :  { %33 = dma.hbm_to_vmem [thread:$0]  %s4026_s1, 128, %s31_s19, [#allocation4]  }
  0x27   :  { %s3383_s16 = scalar_lea.hbm %s4032_s7, 256 }
  0x28   :  { %p3384_p2 = scmp.ne.s32.totalorder %s4032_s7, %s3383_s16  ;;  %p3387_p3 = scmp.lt.u32.totalorder %s3383_s16, %s4032_s7 }
  0x2a   :  { %p3389_p4 = pnand %p3387_p3, %p3384_p2 }
  0x2c   :  { %3392 = shalt.err (!%p3389_p4)
}
  0x2d   :  { %s3393_s23 = scalar_lea.vmem %s60_s21, 256  ;;  %p3398_p6 = scmp.lt.s32.totalorder %s60_s21, %s60_s21 }
  0x2e   :  { %p3394_p5 = scmp.ne.s32.totalorder %s60_s21, %s3393_s23  ;;  %p3399_p7 = scmp.lt.s32.totalorder %s3393_s23, %s3393_s23 }
  0x30   :  { %p3400_p8 = por %p3399_p7, %p3398_p6 }
  0x32   :  { %p3401_p9 = pnand %p3400_p8, %p3394_p5 }
  0x34   :  { %3404 = shalt.err (!%p3401_p9)
}
  0x35   :  { %65 = dma.hbm_to_vmem [thread:$0]  %s4032_s7, 256, %s60_s21, [#allocation7], %s3434_s14, %s3434_s14, %s3435_s15  }
  0x36   :  { %3427 = dma.done.wait [#allocation4], 128  }
  0x37   :  { %3428 = vsyncadd [#allocation4], 4294967168 }
  0x38   :  { %3429 = dma.done.wait [#allocation7], 512  }
  0x39   :  { %3430 = vsyncadd [#allocation7], 4294966784  ;;  %v3438_v1 = vmov 0.0|0.0   ;;  %vm3439_vm0 = vmmov 0   ;;  %v3440_v2 = vmov 0.0   ;;  %v3441_v3 = vmov 0  }
  0x3a   :  { %3022 = vmatprep.subr.bf16.mxu1 %v3438_v1  ;;  %2781 = vmatprep.mubr.msk.f32.mxu1 %vm3439_vm0, %v3440_v2  ;;  %v84_v4 = vld [vmem:[#allocation6] sm:$0xff]  ;;  %v85_v5 = vld [vmem:[#allocation6 + $0x8] sm:$0xff]  ;;  %v230_v7 = vld [vmem:[%s4029_s4] sm:$0xff]  ;;  %vm93_vm1 = vcmask 130048   ;;  %vm235_vm2 = vcmask 261120   ;;  %s3444_s7 = smov 96  }
  0x3b   :  { %3177 = vset.pattern.permute.xlu0 %v3441_v3  ;;  %3178 = vset.pattern.permute.xlu1 %v3441_v3  ;;  %v3023_v6 = vpack.c.bf16 %v85_v5, %v84_v4  ;;  %v231_v8 = vld [vmem:[%s4029_s4 + $0x8] sm:$0xff]  ;;  %v167_v10 = vld [vmem:[%s4025_s0] sm:$0xff]  ;;  %v232_v12 = vld [vmem:[%s4029_s4 + $0x10] sm:$0xff]  ;;  %vm1326_vm3 = vcmask 7168   ;;  %vm1442_vm4 = vcmask 15368   ;;  %s3446_s14 = smov 2  }
  0x3c   :  { %3031 = vmatprep.subr.bf16.mxu0 %v3438_v1  ;;  %2803 = vmatprep.mubr.msk.f32.mxu0 %vm3439_vm0, %v3440_v2  ;;  %v3578_v9 = vpack.c.bf16 %v231_v8, %v230_v7  ;;  %v3583_v11 = vld [vmem:[#allocation3] sm:$0xff]  ;;  %v233_v13 = vld [vmem:[%s4029_s4 + $0x18] sm:$0xff]  ;;  %v2620_v15 = vld [vmem:[%s4030_s5] ss:$0 sm:$0xff]  ;;  %s3442_s5 = smov 64   ;;  %vm1558_vm5 = vcmask 23568  }
  0x3d   :  { %3024 = vmatpush3.bf16.msra.mxu1 %v3023_v6  ;;  %178 = vperm.xlu0 %3177, %v167_v10   ;;  %v3596_v14 = vpack.c.bf16 %v233_v13, %v232_v12  ;;  %v3619_v17 = vld [vmem:[%s4027_s2] ss:$0 sm:$0xff]  ;;  %s3443_s2 = smov 32   ;;  %v168_v37 = vld [vmem:[%s4025_s0 + $0x8] sm:$0xff]  ;;  %v169_v58 = vld [vmem:[%s4025_s0 + $0x10] sm:$0xff]  ;;  %s3448_s21 = smov 4  }
  0x3e   :  { %3025 = vmatprep.subr.bf16.mxu1 %v3438_v1  ;;  %3033 = vmatpush3.bf16.msra.mxu0 %v3578_v9  ;;  %vm1674_vm6 = vcmask 31768   ;;  %vm1790_vm7 = vcmask 39968   ;;  %s3449_s25 = smov 5   ;;  %vm1906_vm8 = vcmask 48168   ;;  %vm2022_vm9 = vcmask 56368   ;;  %s3451_s26 = smov 7  }
  0x3f   :  { %3034 = vmatprep.subr.bf16.mxu0 %v3438_v1  ;;  %s3452_s27 = smov 9   ;;  %vm2138_vm10 = vcmask 64568   ;;  %vm2254_vm11 = vcmask 72768   ;;  %vm2370_vm12 = vcmask 80968   ;;  %s3455_s28 = smov [#allocation9]   ;;  %vm2486_vm13 = vcmask 89168  }
  0x40   :  { %2782 = vmatmul.mubr.msk.f32.vlgmr.msra.gmra.mrb[0].mxu1 %vm93_vm1, %v3583_v11  ;;  %s2610_s29 = sshll.u32 %s3455_s28, 4  ;;  %vm2602_vm14 = vcmask 97368   ;;  %s2611_s29 = int_to_ptr.vmem [resolvable:$true] %s2610_s29 }
  0x41   :  { %3027 = vmatpush3.bf16.msra.mxu1 %v3578_v9  ;;  %2792 = vmatprep.mubr.msk.f32.mxu1 %vm3439_vm0, %v3440_v2  ;;  %s3405_s3 = scalar_lea.vmem %s2611_s29, 128  ;;  %p3410_p11 = scmp.lt.s32.totalorder %s2611_s29, %s2611_s29 }
  0x42   :  { %3028 = vmatprep.subr.bf16.mxu1 %v3438_v1  ;;  %3036 = vmatpush3.bf16.msra.mxu0 %v3596_v14  ;;  %p3406_p10 = scmp.ne.s32.totalorder %s2611_s29, %s3405_s3  ;;  %p3411_p12 = scmp.lt.s32.totalorder %s3405_s3, %s3405_s3 }
  0x43   :  { %3043 = vmatprep.subr.bf16.mxu0 %v3438_v1 }
  0x44   :  { %p3412_p13 = por %p3411_p12, %p3410_p11 }
  0x45   :  { %3030 = vmatpush3.bf16.msra.mxu1 %v3596_v14 }
  0x46   :  { %3037 = vmatprep.subr.bf16.mxu1 %v3438_v1  ;;  %p3413_p0 = pnand %p3412_p13, %p3406_p10 }
  0x48   :  { %2793 = vmatmul.mubr.f32.vlgmr.msra.gmra.mrb[2].mxu1 %v3440_v2 }
  0x49   :  { %3039 = vmatpush3.bf16.msra.mxu1 %v3578_v9  ;;  %2814 = vmatprep.mubr.msk.f32.mxu1 %vm3439_vm0, %v3440_v2 }
  0x4a   :  { %3040 = vmatprep.subr.bf16.mxu1 %v3438_v1 }
  0x4d   :  { %3042 = vmatpush3.bf16.msra.mxu1 %v3596_v14 }
  0x4e   :  { %3049 = vmatprep.subr.bf16.mxu1 %v3438_v1 }
  0xbc   :  { %v179_v18 = vpop.permute.xlu0 %178 }
  0xbd   :  { %v222_v21 = vmul.f32 %v3619_v17, %v179_v18 }
 0x113   :  { %v163_v16 = vpop.f32.mrb[0].mxu1 }
 0x114   :  { %v2783_v19 = vpop.f32.mrb[1].mxu1  ;;  %v3621_v20 = vadd.f32 %v2620_v15, %v163_v16 }
 0x116   :  { %v234_v22 = vadd.f32 %v222_v21, %v3621_v20 }
 0x11b   :  { %v305_v23 = vpop.f32.mrb[2].mxu1 }
 0x11c   :  { %v309_v24 = vadd.f32 %v305_v23, %v234_v22  ;;  %v2794_v25 = vpop.f32.mrb[3].mxu1  ;;  %v170_v22 = vld [vmem:[%s4025_s0 + $0x18] sm:$0xff] }
 0x11e   :  { %3179 = vtanh.f32 %v309_v24  ;;  %v2623_v27 = vmul.f32 -1.442695, %v309_v24 }
 0x120   :  { %3181 = vpow2.f32 %v2623_v27 }
 0x128   :  { %v3180_v26 = vpop.eup %3179 }
 0x129   :  { %319 = vrot.lane.b32.xlu0 %v3180_v26, %s3442_s5 }
 0x12a   :  { %v3182_v28 = vpop.eup %3181 }
 0x12b   :  { %v313_v29 = vadd.f32 1.0, %v3182_v28 }
 0x12d   :  { %3183 = vrcp.f32 %v313_v29 }
 0x137   :  { %v3184_v30 = vpop.eup %3183 }
 0x138   :  { %v317_v33 = vmul.f32 0.0, %v3184_v30 }
 0x19b   :  { %v320_v31 = vpop.permute.xlu0 %319 }
 0x19c   :  { %v322_v32 = vmul.f32 %v3184_v30, %v320_v31 }
 0x19e   :  { %324 = vrot.lane.b32.xlu1 %v322_v32, %s3443_s2 }
 0x210   :  { %v325_v34 = vpop.permute.xlu1 %324 }
 0x211   :  { %v327_v35 = vadd.f32 %v325_v34, %v317_v33 }
 0x213   :  { %3185 = vtanh.f32 %v327_v35 }
 0x21d   :  { %v3186_v36 = vpop.eup %3185 }
 0x21e   :  { %330 = vrot.lane.b32.xlu1 %v3186_v36, %s3442_s5 }
 0x222   :  { %183 = vperm.xlu1 %3178, %v168_v37  }
 0x290   :  { %v331_v38 = vpop.permute.xlu1 %330 }
 0x291   :  { %v333_v39 = vmul.f32 %v3184_v30, %v331_v38 }
 0x293   :  { %336 = vrot.lane.b32.xlu0 %v333_v39, %s3443_s2 }
 0x2a1   :  { %v184_v41 = vpop.permute.xlu1 %183 }
 0x2a2   :  { %v223_v42 = vmul.f32 %v3619_v17, %v184_v41 }
 0x2a4   :  { %v334_v43 = vadd.f32 %v223_v42, %v3621_v20 }
 0x305   :  { %v337_v40 = vpop.permute.xlu0 %336 }
 0x306   :  { %2804 = vmatmul.mubr.msk.f32.vlgmr.msra.gmra.mrb[0].mxu0 %vm235_vm2, %v337_v40 }
 0x307   :  { %3045 = vmatpush3.bf16.msra.mxu0 %v3578_v9  ;;  %2825 = vmatprep.mubr.msk.f32.mxu0 %vm3439_vm0, %v3440_v2 }
 0x308   :  { %3046 = vmatprep.subr.bf16.mxu0 %v3438_v1 }
 0x30b   :  { %3048 = vmatpush3.bf16.msra.mxu0 %v3596_v14 }
 0x30c   :  { %3055 = vmatprep.subr.bf16.mxu0 %v3438_v1 }
 0x3d9   :  { %v406_v44 = vpop.f32.mrb[0].mxu0 }
 0x3da   :  { %v410_v45 = vadd.f32 %v406_v44, %v334_v43  ;;  %v2805_v46 = vpop.f32.mrb[1].mxu0  ;;  %v171_v43 = vld [vmem:[%s4025_s0 + $0x20] sm:$0xff] }
 0x3dc   :  { %3187 = vtanh.f32 %v410_v45  ;;  %v2625_v48 = vmul.f32 -1.442695, %v410_v45 }
 0x3de   :  { %3189 = vpow2.f32 %v2625_v48 }
 0x3e6   :  { %v3188_v47 = vpop.eup %3187 }
 0x3e7   :  { %420 = vrot.lane.b32.xlu0 %v3188_v47, %s3442_s5 }
 0x3e8   :  { %v3190_v49 = vpop.eup %3189 }
 0x3e9   :  { %v414_v50 = vadd.f32 1.0, %v3190_v49 }
 0x3eb   :  { %3191 = vrcp.f32 %v414_v50 }
 0x3f5   :  { %v3192_v51 = vpop.eup %3191 }
 0x3f6   :  { %v418_v54 = vmul.f32 %v3192_v51, %v327_v35 }
 0x459   :  { %v421_v52 = vpop.permute.xlu0 %420 }
 0x45a   :  { %v423_v53 = vmul.f32 %v3192_v51, %v421_v52 }
 0x45c   :  { %425 = vrot.lane.b32.xlu1 %v423_v53, %s3443_s2 }
 0x4ce   :  { %v426_v55 = vpop.permute.xlu1 %425 }
 0x4cf   :  { %v428_v56 = vadd.f32 %v426_v55, %v418_v54 }
 0x4d1   :  { %3193 = vtanh.f32 %v428_v56 }
 0x4db   :  { %v3194_v57 = vpop.eup %3193 }
 0x4dc   :  { %431 = vrot.lane.b32.xlu0 %v3194_v57, %s3442_s5 }
 0x4e0   :  { %188 = vperm.xlu0 %3177, %v169_v58  }
 0x54e   :  { %v432_v59 = vpop.permute.xlu0 %431 }
 0x54f   :  { %v434_v60 = vmul.f32 %v3192_v51, %v432_v59 }
 0x551   :  { %437 = vrot.lane.b32.xlu1 %v434_v60, %s3443_s2 }
 0x55f   :  { %v189_v62 = vpop.permute.xlu0 %188 }
 0x560   :  { %v224_v63 = vmul.f32 %v3619_v17, %v189_v62 }
 0x562   :  { %v435_v0 = vadd.f32 %v224_v63, %v3621_v20 }
 0x5c3   :  { %v438_v61 = vpop.permute.xlu1 %437 }
 0x5c4   :  { %2815 = vmatmul.mubr.msk.f32.vlgmr.msra.gmra.mrb[4].mxu1 %vm235_vm2, %v438_v61 }
 0x5c5   :  { %3051 = vmatpush3.bf16.msra.mxu1 %v3578_v9  ;;  %2836 = vmatprep.mubr.msk.f32.mxu1 %vm3439_vm0, %v3440_v2 }
 0x5c6   :  { %3052 = vmatprep.subr.bf16.mxu1 %v3438_v1 }
 0x5c9   :  { %3054 = vmatpush3.bf16.msra.mxu1 %v3596_v14 }
 0x5ca   :  { %3061 = vmatprep.subr.bf16.mxu1 %v3438_v1 }
 0x697   :  { %v507_v3 = vpop.f32.mrb[4].mxu1 }
 0x698   :  { %v511_v4 = vadd.f32 %v507_v3, %v435_v0  ;;  %v2816_v5 = vpop.f32.mrb[5].mxu1  ;;  %v172_v0 = vld [vmem:[%s4025_s0 + $0x28] sm:$0xff] }
 0x69a   :  { %3195 = vtanh.f32 %v511_v4  ;;  %v2627_v7 = vmul.f32 -1.442695, %v511_v4 }
 0x69c   :  { %3197 = vpow2.f32 %v2627_v7 }
 0x6a4   :  { %v3196_v6 = vpop.eup %3195 }
 0x6a5   :  { %521 = vrot.lane.b32.xlu1 %v3196_v6, %s3442_s5 }
 0x6a6   :  { %v3198_v8 = vpop.eup %3197 }
 0x6a7   :  { %v515_v10 = vadd.f32 1.0, %v3198_v8 }
 0x6a9   :  { %3199 = vrcp.f32 %v515_v10 }
 0x6b3   :  { %v3200_v12 = vpop.eup %3199 }
 0x6b4   :  { %v519_v16 = vmul.f32 %v3200_v12, %v428_v56 }
 0x717   :  { %v522_v13 = vpop.permute.xlu1 %521 }
 0x718   :  { %v524_v15 = vmul.f32 %v3200_v12, %v522_v13 }
 0x71a   :  { %526 = vrot.lane.b32.xlu0 %v524_v15, %s3443_s2 }
 0x78c   :  { %v527_v18 = vpop.permute.xlu0 %526 }
 0x78d   :  { %v529_v19 = vadd.f32 %v527_v18, %v519_v16 }
 0x78f   :  { %3201 = vtanh.f32 %v529_v19 }
 0x799   :  { %v3202_v21 = vpop.eup %3201 }
 0x79a   :  { %532 = vrot.lane.b32.xlu1 %v3202_v21, %s3442_s5 }
 0x79e   :  { %193 = vperm.xlu1 %3178, %v170_v22  }
 0x80c   :  { %v533_v23 = vpop.permute.xlu1 %532 }
 0x80d   :  { %v535_v24 = vmul.f32 %v3200_v12, %v533_v23 }
 0x80f   :  { %538 = vrot.lane.b32.xlu0 %v535_v24, %s3443_s2 }
 0x81d   :  { %v194_v26 = vpop.permute.xlu1 %193 }
 0x81e   :  { %v225_v27 = vmul.f32 %v3619_v17, %v194_v26  ;;  %v173_v26 = vld [vmem:[%s4025_s0 + $0x30] sm:$0xff] }
 0x820   :  { %v536_v28 = vadd.f32 %v225_v27, %v3621_v20 }
 0x881   :  { %v539_v25 = vpop.permute.xlu0 %538 }
 0x882   :  { %2826 = vmatmul.mubr.msk.f32.vlgmr.msra.gmra.mrb[2].mxu0 %vm235_vm2, %v539_v25 }
 0x883   :  { %3057 = vmatpush3.bf16.msra.mxu0 %v3578_v9  ;;  %2847 = vmatprep.mubr.msk.f32.mxu0 %vm3439_vm0, %v3440_v2 }
 0x884   :  { %3058 = vmatprep.subr.bf16.mxu0 %v3438_v1 }
 0x887   :  { %3060 = vmatpush3.bf16.msra.mxu0 %v3596_v14 }
 0x888   :  { %3067 = vmatprep.subr.bf16.mxu0 %v3438_v1 }
 0x955   :  { %v608_v29 = vpop.f32.mrb[2].mxu0 }
 0x956   :  { %v612_v30 = vadd.f32 %v608_v29, %v536_v28  ;;  %v2827_v31 = vpop.f32.mrb[3].mxu0 }
 0x958   :  { %3203 = vtanh.f32 %v612_v30  ;;  %v2629_v33 = vmul.f32 -1.442695, %v612_v30 }
 0x95a   :  { %3205 = vpow2.f32 %v2629_v33 }
 0x962   :  { %v3204_v32 = vpop.eup %3203 }
 0x963   :  { %622 = vrot.lane.b32.xlu0 %v3204_v32, %s3442_s5 }
 0x964   :  { %v3206_v34 = vpop.eup %3205 }
 0x965   :  { %v616_v35 = vadd.f32 1.0, %v3206_v34 }
 0x967   :  { %3207 = vrcp.f32 %v616_v35 }
 0x971   :  { %v3208_v36 = vpop.eup %3207 }
 0x972   :  { %v620_v39 = vmul.f32 %v3208_v36, %v529_v19 }
 0x9d5   :  { %v623_v37 = vpop.permute.xlu0 %622 }
 0x9d6   :  { %v625_v38 = vmul.f32 %v3208_v36, %v623_v37 }
 0x9d8   :  { %627 = vrot.lane.b32.xlu1 %v625_v38, %s3443_s2 }
 0xa4a   :  { %v628_v40 = vpop.permute.xlu1 %627 }
 0xa4b   :  { %v630_v41 = vadd.f32 %v628_v40, %v620_v39 }
 0xa4d   :  { %3209 = vtanh.f32 %v630_v41 }
 0xa57   :  { %v3210_v42 = vpop.eup %3209 }
 0xa58   :  { %633 = vrot.lane.b32.xlu0 %v3210_v42, %s3442_s5 }
 0xa5c   :  { %198 = vperm.xlu0 %3177, %v171_v43  }
 0xaca   :  { %v634_v44 = vpop.permute.xlu0 %633 }
 0xacb   :  { %v636_v45 = vmul.f32 %v3208_v36, %v634_v44 }
 0xacd   :  { %639 = vrot.lane.b32.xlu1 %v636_v45, %s3443_s2 }
 0xadb   :  { %v199_v47 = vpop.permute.xlu0 %198 }
 0xadc   :  { %v226_v48 = vmul.f32 %v3619_v17, %v199_v47  ;;  %v174_v47 = vld [vmem:[%s4025_s0 + $0x38] sm:$0xff]  ;;  %s3454_s0 = smov 10  }
 0xade   :  { %v637_v49 = vadd.f32 %v226_v48, %v3621_v20 }
 0xb3f   :  { %v640_v46 = vpop.permute.xlu1 %639 }
 0xb40   :  { %2837 = vmatmul.mubr.msk.f32.vlgmr.msra.gmra.mrb[6].mxu1 %vm235_vm2, %v640_v46 }
 0xb41   :  { %3063 = vmatpush3.bf16.msra.mxu1 %v3578_v9  ;;  %2858 = vmatprep.mubr.msk.f32.mxu1 %vm3439_vm0, %v3440_v2 }
 0xb42   :  { %3064 = vmatprep.subr.bf16.mxu1 %v3438_v1 }
 0xb45   :  { %3066 = vmatpush3.bf16.msra.mxu1 %v3596_v14 }
 0xb46   :  { %3073 = vmatprep.subr.bf16.mxu1 %v3438_v1 }
 0xc13   :  { %v709_v50 = vpop.f32.mrb[6].mxu1 }
 0xc14   :  { %v713_v51 = vadd.f32 %v709_v50, %v637_v49  ;;  %v2838_v52 = vpop.f32.mrb[7].mxu1 }
 0xc16   :  { %3211 = vtanh.f32 %v713_v51  ;;  %v2631_v54 = vmul.f32 -1.442695, %v713_v51 }
 0xc18   :  { %3213 = vpow2.f32 %v2631_v54 }
 0xc20   :  { %v3212_v53 = vpop.eup %3211 }
 0xc21   :  { %723 = vrot.lane.b32.xlu1 %v3212_v53, %s3442_s5 }
 0xc22   :  { %v3214_v55 = vpop.eup %3213 }
 0xc23   :  { %v717_v56 = vadd.f32 1.0, %v3214_v55 }
 0xc25   :  { %3215 = vrcp.f32 %v717_v56 }
 0xc2f   :  { %v3216_v57 = vpop.eup %3215 }
 0xc30   :  { %v721_v60 = vmul.f32 %v3216_v57, %v630_v41 }
 0xc93   :  { %v724_v58 = vpop.permute.xlu1 %723 }
 0xc94   :  { %v726_v59 = vmul.f32 %v3216_v57, %v724_v58 }
 0xc96   :  { %728 = vrot.lane.b32.xlu0 %v726_v59, %s3443_s2 }
 0xd08   :  { %v729_v61 = vpop.permute.xlu0 %728 }
 0xd09   :  { %v731_v62 = vadd.f32 %v729_v61, %v721_v60 }
 0xd0b   :  { %3217 = vtanh.f32 %v731_v62 }
 0xd15   :  { %v3218_v63 = vpop.eup %3217 }
 0xd16   :  { %734 = vrot.lane.b32.xlu1 %v3218_v63, %s3442_s5 }
 0xd1a   :  { %203 = vperm.xlu1 %3178, %v172_v0  }
 0xd88   :  { %v735_v3 = vpop.permute.xlu1 %734 }
 0xd89   :  { %v737_v4 = vmul.f32 %v3216_v57, %v735_v3  ;;  %v1046_v3 = vld [vmem:[#allocation8] sm:$0xff] }
 0xd8b   :  { %740 = vrot.lane.b32.xlu0 %v737_v4, %s3443_s2  ;;  %v1047_v4 = vld [vmem:[#allocation8 + $0x8] sm:$0xff] }
 0xd99   :  { %v204_v6 = vpop.permute.xlu1 %203 }
 0xd9a   :  { %v227_v7 = vmul.f32 %v3619_v17, %v204_v6  ;;  %v3074_v6 = vpack.c.bf16 %v1047_v4, %v1046_v3 }
 0xd9c   :  { %v738_v8 = vadd.f32 %v227_v7, %v3621_v20  ;;  %v1043_v7 = vld [vmem:[%s4031_s6 + $0x8] sm:$0xff] }
 0xdfd   :  { %v741_v5 = vpop.permute.xlu0 %740 }
 0xdfe   :  { %2848 = vmatmul.mubr.msk.f32.vlgmr.msra.gmra.mrb[4].mxu0 %vm235_vm2, %v741_v5  ;;  %v1042_v5 = vld [vmem:[%s4031_s6] sm:$0xff] }
 0xdff   :  { %3069 = vmatpush3.bf16.msra.mxu0 %v3578_v9  ;;  %2869 = vmatprep.mubr.msk.f32.mxu0 %vm3439_vm0, %v3440_v2 }
 0xe00   :  { %3070 = vmatprep.subr.bf16.mxu0 %v3438_v1 }
 0xe03   :  { %3072 = vmatpush3.bf16.msra.mxu0 %v3596_v14 }
 0xe04   :  { %3076 = vmatprep.subr.bf16.mxu0 %v3438_v1 }
 0xed1   :  { %v810_v10 = vpop.f32.mrb[4].mxu0 }
 0xed2   :  { %v814_v12 = vadd.f32 %v810_v10, %v738_v8  ;;  %v2849_v13 = vpop.f32.mrb[5].mxu0  ;;  %v1201_v8 = vld [vmem:[%s4033_s8] sm:$0xff]  ;;  %v1202_v10 = vld [vmem:[%s4033_s8 + $0x8] sm:$0xff] }
 0xed3   :  { %v1044_v13 = vld [vmem:[%s4031_s6 + $0x10] sm:$0xff] }
 0xed4   :  { %3219 = vtanh.f32 %v814_v12  ;;  %v2633_v9 = vmul.f32 -1.442695, %v814_v12  ;;  %v3077_v12 = vpack.c.bf16 %v1043_v7, %v1042_v5 }
 0xed6   :  { %3221 = vpow2.f32 %v2633_v9  ;;  %v3749_v9 = vpack.c.bf16 %v1202_v10, %v1201_v8 }
 0xede   :  { %v3220_v15 = vpop.eup %3219 }
 0xedf   :  { %824 = vrot.lane.b32.xlu0 %v3220_v15, %s3442_s5  ;;  %v1045_v15 = vld [vmem:[%s4031_s6 + $0x18] sm:$0xff] }
 0xee0   :  { %v3222_v16 = vpop.eup %3221 }
 0xee1   :  { %v818_v18 = vadd.f32 1.0, %v3222_v16  ;;  %v3080_v16 = vpack.c.bf16 %v1045_v15, %v1044_v13 }
 0xee3   :  { %3223 = vrcp.f32 %v818_v18 }
 0xeed   :  { %v3224_v14 = vpop.eup %3223 }
 0xeee   :  { %v822_v22 = vmul.f32 %v3224_v14, %v731_v62 }
 0xf51   :  { %v825_v19 = vpop.permute.xlu0 %824 }
 0xf52   :  { %v827_v21 = vmul.f32 %v3224_v14, %v825_v19 }
 0xf54   :  { %829 = vrot.lane.b32.xlu1 %v827_v21, %s3443_s2 }
 0xfc6   :  { %v830_v23 = vpop.permute.xlu1 %829 }
 0xfc7   :  { %v832_v24 = vadd.f32 %v830_v23, %v822_v22 }
 0xfc9   :  { %3225 = vtanh.f32 %v832_v24 }
 0xfd3   :  { %v3226_v25 = vpop.eup %3225 }
 0xfd4   :  { %835 = vrot.lane.b32.xlu0 %v3226_v25, %s3442_s5 }
 0xfd8   :  { %208 = vperm.xlu0 %3177, %v173_v26  }
0x1046   :  { %v836_v27 = vpop.permute.xlu0 %835 }
0x1047   :  { %v838_v28 = vmul.f32 %v3224_v14, %v836_v27  ;;  %v1203_v14 = vld [vmem:[%s4033_s8 + $0x10] sm:$0xff] }
0x1049   :  { %841 = vrot.lane.b32.xlu1 %v838_v28, %s3443_s2 }
0x1057   :  { %v209_v30 = vpop.permute.xlu0 %208 }
0x1058   :  { %v228_v31 = vmul.f32 %v3619_v17, %v209_v30  ;;  %v2640_v30 = vld [vmem:[%s4034_s9] ss:$0 sm:$0xff] }
0x105a   :  { %v839_v32 = vadd.f32 %v228_v31, %v3621_v20 }
0x10bb   :  { %v842_v29 = vpop.permute.xlu1 %841 }
0x10bc   :  { %2859 = vmatmul.mubr.msk.f32.vlgmr.msra.gmra.mrb[8].mxu1 %vm235_vm2, %v842_v29 }
0x10bd   :  { %2876 = vmatprep.mubr.msk.f32.mxu1 %vm3439_vm0, %v3440_v2  ;;  %3075 = vmatpush3.bf16.msra.mxu1 %v3074_v6 }
0x10be   :  { %3082 = vmatprep.subr.bf16.mxu1 %v3438_v1 }
0x10c0   :  { %2877 = vmatmul.mubr.msk.f32.vlgmr.msra.gmra.mrb[10].mxu1 %vm93_vm1, %v3583_v11  ;;  %v1204_v11 = vld [vmem:[%s4033_s8 + $0x18] sm:$0xff] }
0x10c1   :  { %3084 = vmatpush3.bf16.msra.mxu1 %v3749_v9  ;;  %2898 = vmatprep.mubr.msk.f32.mxu1 %vm3439_vm0, %v3440_v2  ;;  %v3767_v19 = vpack.c.bf16 %v1204_v11, %v1203_v14 }
0x10c2   :  { %3085 = vmatprep.subr.bf16.mxu1 %v3438_v1 }
0x10c5   :  { %3087 = vmatpush3.bf16.msra.mxu1 %v3767_v19 }
0x10c6   :  { %3094 = vmatprep.subr.bf16.mxu1 %v3438_v1 }
0x10c8   :  { %2899 = vmatmul.mubr.f32.vlgmr.msra.gmra.mrb[12].mxu1 %v3440_v2 }
0x10c9   :  { %3096 = vmatpush3.bf16.msra.mxu1 %v3749_v9  ;;  %2920 = vmatprep.mubr.msk.f32.mxu1 %vm3439_vm0, %v3440_v2 }
0x10ca   :  { %3097 = vmatprep.subr.bf16.mxu1 %v3438_v1 }
0x10cd   :  { %3099 = vmatpush3.bf16.msra.mxu1 %v3767_v19 }
0x10ce   :  { %3106 = vmatprep.subr.bf16.mxu1 %v3438_v1 }
0x118f   :  { %v911_v33 = vpop.f32.mrb[8].mxu1 }
0x1190   :  { %v915_v34 = vadd.f32 %v911_v33, %v839_v32  ;;  %v2860_v35 = vpop.f32.mrb[9].mxu1 }
0x1192   :  { %3227 = vtanh.f32 %v915_v34  ;;  %v2635_v37 = vmul.f32 -1.442695, %v915_v34 }
0x1194   :  { %3229 = vpow2.f32 %v2635_v37 }
0x119c   :  { %v3228_v36 = vpop.eup %3227 }
0x119d   :  { %925 = vrot.lane.b32.xlu1 %v3228_v36, %s3442_s5 }
0x119e   :  { %v3230_v38 = vpop.eup %3229 }
0x119f   :  { %v919_v39 = vadd.f32 1.0, %v3230_v38 }
0x11a1   :  { %3231 = vrcp.f32 %v919_v39 }
0x11ab   :  { %v3232_v40 = vpop.eup %3231 }
0x11ac   :  { %v923_v43 = vmul.f32 %v3232_v40, %v832_v24  ;;  %v1114_v24 = vpop.f32.mrb[10].mxu1 }
0x11ad   :  { %v2878_v25 = vpop.f32.mrb[11].mxu1 }
0x11ae   :  { %v1273_v27 = vpop.f32.mrb[12].mxu1 }
0x11af   :  { %v2900_v28 = vpop.f32.mrb[13].mxu1 }
0x120f   :  { %v926_v41 = vpop.permute.xlu1 %925 }
0x1210   :  { %v928_v42 = vmul.f32 %v3232_v40, %v926_v41 }
0x1212   :  { %930 = vrot.lane.b32.xlu0 %v928_v42, %s3443_s2 }
0x1284   :  { %v931_v44 = vpop.permute.xlu0 %930 }
0x1285   :  { %v933_v45 = vadd.f32 %v931_v44, %v923_v43 }
0x1287   :  { %3233 = vtanh.f32 %v933_v45 }
0x1291   :  { %v3234_v46 = vpop.eup %3233 }
0x1292   :  { %936 = vrot.lane.b32.xlu1 %v3234_v46, %s3442_s5 }
0x1296   :  { %213 = vperm.xlu1 %3178, %v174_v47  }
0x1304   :  { %v937_v48 = vpop.permute.xlu1 %936 }
0x1305   :  { %v939_v49 = vmul.f32 %v3232_v40, %v937_v48 }
0x1307   :  { %942 = vrot.lane.b32.xlu0 %v939_v49, %s3443_s2 }
0x1315   :  { %v214_v51 = vpop.permute.xlu1 %213 }
0x1316   :  { %v229_v52 = vmul.f32 %v3619_v17, %v214_v51 }
0x1318   :  { %v940_v53 = vadd.f32 %v229_v52, %v3621_v20 }
0x1379   :  { %v943_v50 = vpop.permute.xlu0 %942 }
0x137a   :  { %2870 = vmatmul.mubr.msk.f32.vlgmr.msra.gmra.mrb[6].mxu0 %vm235_vm2, %v943_v50 }
0x137b   :  { %2887 = vmatprep.mubr.msk.f32.mxu0 %vm3439_vm0, %v3440_v2  ;;  %3078 = vmatpush3.bf16.msra.mxu0 %v3077_v12 }
0x137c   :  { %3079 = vmatprep.subr.bf16.mxu0 %v3438_v1 }
0x137f   :  { %3081 = vmatpush3.bf16.msra.mxu0 %v3080_v16 }
0x1380   :  { %3088 = vmatprep.subr.bf16.mxu0 %v3438_v1 }
0x144d   :  { %v1012_v54 = vpop.f32.mrb[6].mxu0 }
0x144e   :  { %v1016_v55 = vadd.f32 %v1012_v54, %v940_v53  ;;  %v2871_v56 = vpop.f32.mrb[7].mxu0 }
0x1450   :  { %3235 = vtanh.f32 %v1016_v55  ;;  %v2637_v58 = vmul.f32 -1.442695, %v1016_v55 }
0x1452   :  { %3237 = vpow2.f32 %v2637_v58 }
0x145a   :  { %v3236_v57 = vpop.eup %3235 }
0x145b   :  { %1026 = vrot.lane.b32.xlu0 %v3236_v57, %s3442_s5 }
0x145c   :  { %v3238_v59 = vpop.eup %3237 }
0x145d   :  { %v1020_v60 = vadd.f32 1.0, %v3238_v59 }
0x145f   :  { %3239 = vrcp.f32 %v1020_v60 }
0x1469   :  { %v3240_v61 = vpop.eup %3239 }
0x146a   :  { %v1024_v17 = vmul.f32 %v3240_v61, %v933_v45 }
0x14cd   :  { %v1027_v62 = vpop.permute.xlu0 %1026 }
0x14ce   :  { %v1029_v63 = vmul.f32 %v3240_v61, %v1027_v62 }
0x14d0   :  { %1031 = vrot.lane.b32.xlu1 %v1029_v63, %s3443_s2 }
0x1542   :  { %v1032_v0 = vpop.permute.xlu1 %1031 }
0x1543   :  { %v1034_v20 = vadd.f32 %v1032_v0, %v1024_v17 }
0x1545   :  { %3241 = vtanh.f32 %v1034_v20 }
0x154f   :  { %v3242_v18 = vpop.eup %3241 }
0x1550   :  { %1037 = vrot.lane.b32.xlu0 %v3242_v18, %s3442_s5 }
0x15c2   :  { %v1038_v21 = vpop.permute.xlu0 %1037 }
0x15c3   :  { %v1040_v22 = vmul.f32 %v3240_v61, %v1038_v21 }
0x15c5   :  { %v1041_v23 = vmax.f32 %v1040_v22, 0.0 }
0x15c7   :  { %1119 = vrot.lane.b32.xlu1 %v1041_v23, %s3443_s2 }
0x1639   :  { %v1120_v26 = vpop.permute.xlu1 %1119 }
0x163a   :  { %2888 = vmatmul.mubr.msk.f32.vlgmr.msra.gmra.mrb[8].mxu0 %vm235_vm2, %v1120_v26 }
0x163b   :  { %3090 = vmatpush3.bf16.msra.mxu0 %v3749_v9  ;;  %2909 = vmatprep.mubr.msk.f32.mxu0 %vm3439_vm0, %v3440_v2 }
0x163c   :  { %3091 = vmatprep.subr.bf16.mxu0 %v3438_v1 }
0x163f   :  { %3093 = vmatpush3.bf16.msra.mxu0 %v3767_v19 }
0x1640   :  { %3100 = vmatprep.subr.bf16.mxu0 %v3438_v1 }
0x170d   :  { %v1189_v29 = vpop.f32.mrb[8].mxu0 }
0x170e   :  { %v1190_v31 = vadd.f32 %v1189_v29, %v1114_v24  ;;  %v2889_v32 = vpop.f32.mrb[9].mxu0 }
0x1710   :  { %v3789_v33 = vadd.f32 %v2640_v30, %v1190_v31 }
0x1712   :  { %v1277_v34 = vadd.f32 %v1273_v27, %v3789_v33 }
0x1714   :  { %3243 = vtanh.f32 %v1277_v34  ;;  %v2641_v36 = vmul.f32 -1.442695, %v1277_v34 }
0x1716   :  { %3245 = vpow2.f32 %v2641_v36 }
0x171e   :  { %v3244_v35 = vpop.eup %3243 }
0x171f   :  { %1287 = vrot.lane.b32.xlu0 %v3244_v35, %s3442_s5 }
0x1720   :  { %v3246_v37 = vpop.eup %3245 }
0x1721   :  { %v1281_v38 = vadd.f32 1.0, %v3246_v37 }
0x1723   :  { %3247 = vrcp.f32 %v1281_v38 }
0x172d   :  { %v3248_v39 = vpop.eup %3247 }
0x172e   :  { %v1285_v42 = vmul.f32 0.0, %v3248_v39 }
0x1791   :  { %v1288_v40 = vpop.permute.xlu0 %1287 }
0x1792   :  { %v1290_v41 = vmul.f32 %v3248_v39, %v1288_v40 }
0x1794   :  { %1292 = vrot.lane.b32.xlu1 %v1290_v41, %s3443_s2 }
0x1806   :  { %v1293_v43 = vpop.permute.xlu1 %1292 }
0x1807   :  { %v1295_v44 = vadd.f32 %v1293_v43, %v1285_v42 }
0x1809   :  { %3249 = vtanh.f32 %v1295_v44 }
0x1813   :  { %v3250_v45 = vpop.eup %3249 }
0x1814   :  { %1298 = vrot.lane.b32.xlu0 %v3250_v45, %s3442_s5 }
0x1886   :  { %v1299_v46 = vpop.permute.xlu0 %1298 }
0x1887   :  { %v3795_v47 = vmul.f32 %v3248_v39, %v1299_v46 }
0x1889   :  { %1329 = vrot.lane.b32.xlu1 %v3795_v47, %s3443_s2 }
0x18fb   :  { %v1330_v48 = vpop.permute.xlu1 %1329 }
0x18fc   :  { %2910 = vmatmul.mubr.msk.f32.vlgmr.msra.gmra.mrb[10].mxu0 %vm235_vm2, %v1330_v48 }
0x18fd   :  { %3102 = vmatpush3.bf16.msra.mxu0 %v3749_v9  ;;  %2931 = vmatprep.mubr.msk.f32.mxu0 %vm3439_vm0, %v3440_v2 }
0x18fe   :  { %3103 = vmatprep.subr.bf16.mxu0 %v3438_v1 }
0x1901   :  { %3105 = vmatpush3.bf16.msra.mxu0 %v3767_v19 }
0x1902   :  { %3112 = vmatprep.subr.bf16.mxu0 %v3438_v1 }
0x19cf   :  { %v1399_v49 = vpop.f32.mrb[10].mxu0 }
0x19d0   :  { %v1403_v50 = vadd.f32 %v1399_v49, %v3789_v33  ;;  %v2911_v51 = vpop.f32.mrb[11].mxu0 }
0x19d2   :  { %3251 = vtanh.f32 %v1403_v50  ;;  %v2645_v53 = vmul.f32 -1.442695, %v1403_v50 }
0x19d4   :  { %3253 = vpow2.f32 %v2645_v53 }
0x19dc   :  { %v3252_v52 = vpop.eup %3251 }
0x19dd   :  { %1413 = vrot.lane.b32.xlu0 %v3252_v52, %s3442_s5 }
0x19de   :  { %v3254_v54 = vpop.eup %3253 }
0x19df   :  { %v1407_v55 = vadd.f32 1.0, %v3254_v54 }
0x19e1   :  { %3255 = vrcp.f32 %v1407_v55 }
0x19eb   :  { %v3256_v56 = vpop.eup %3255 }
0x19ec   :  { %v1411_v59 = vmul.f32 %v3256_v56, %v1295_v44 }
0x1a4f   :  { %v1414_v57 = vpop.permute.xlu0 %1413 }
0x1a50   :  { %v1416_v58 = vmul.f32 %v3256_v56, %v1414_v57 }
0x1a52   :  { %1418 = vrot.lane.b32.xlu1 %v1416_v58, %s3443_s2 }
0x1ac4   :  { %v1419_v60 = vpop.permute.xlu1 %1418 }
0x1ac5   :  { %v1421_v61 = vadd.f32 %v1419_v60, %v1411_v59 }
0x1ac7   :  { %3257 = vtanh.f32 %v1421_v61 }
0x1ad1   :  { %v3258_v62 = vpop.eup %3257 }
0x1ad2   :  { %1424 = vrot.lane.b32.xlu0 %v3258_v62, %s3442_s5 }
0x1b44   :  { %v1425_v63 = vpop.permute.xlu0 %1424 }
0x1b45   :  { %v3810_v17 = vmul.f32 %v3256_v56, %v1425_v63 }
0x1b47   :  { %1445 = vrot.lane.b32.xlu1 %v3810_v17, %s3443_s2 }
0x1bb9   :  { %v1446_v0 = vpop.permute.xlu1 %1445 }
0x1bba   :  { %2921 = vmatmul.mubr.msk.f32.vlgmr.msra.gmra.mrb[14].mxu1 %vm235_vm2, %v1446_v0 }
0x1bbb   :  { %3108 = vmatpush3.bf16.msra.mxu1 %v3749_v9  ;;  %2942 = vmatprep.mubr.msk.f32.mxu1 %vm3439_vm0, %v3440_v2 }
0x1bbc   :  { %3109 = vmatprep.subr.bf16.mxu1 %v3438_v1 }
0x1bbf   :  { %3111 = vmatpush3.bf16.msra.mxu1 %v3767_v19 }
0x1bc0   :  { %3118 = vmatprep.subr.bf16.mxu1 %v3438_v1 }
0x1c8d   :  { %v1515_v20 = vpop.f32.mrb[14].mxu1 }
0x1c8e   :  { %v1519_v3 = vadd.f32 %v1515_v20, %v3789_v33  ;;  %v2922_v4 = vpop.f32.mrb[15].mxu1 }
0x1c90   :  { %3259 = vtanh.f32 %v1519_v3  ;;  %v2647_v6 = vmul.f32 -1.442695, %v1519_v3 }
0x1c92   :  { %3261 = vpow2.f32 %v2647_v6 }
0x1c9a   :  { %v3260_v5 = vpop.eup %3259 }
0x1c9b   :  { %1529 = vrot.lane.b32.xlu0 %v3260_v5, %s3442_s5 }
0x1c9c   :  { %v3262_v7 = vpop.eup %3261 }
0x1c9d   :  { %v1523_v8 = vadd.f32 1.0, %v3262_v7 }
0x1c9f   :  { %3263 = vrcp.f32 %v1523_v8 }
0x1ca9   :  { %v3264_v10 = vpop.eup %3263 }
0x1caa   :  { %v1527_v15 = vmul.f32 %v3264_v10, %v1421_v61 }
0x1d0d   :  { %v1530_v12 = vpop.permute.xlu0 %1529 }
0x1d0e   :  { %v1532_v13 = vmul.f32 %v3264_v10, %v1530_v12 }
0x1d10   :  { %1534 = vrot.lane.b32.xlu1 %v1532_v13, %s3443_s2 }
0x1d82   :  { %v1535_v16 = vpop.permute.xlu1 %1534 }
0x1d83   :  { %v1537_v18 = vadd.f32 %v1535_v16, %v1527_v15 }
0x1d85   :  { %3265 = vtanh.f32 %v1537_v18 }
0x1d8f   :  { %v3266_v14 = vpop.eup %3265 }
0x1d90   :  { %1540 = vrot.lane.b32.xlu0 %v3266_v14, %s3442_s5 }
0x1e02   :  { %v1541_v11 = vpop.permute.xlu0 %1540 }
0x1e03   :  { %v3825_v21 = vmul.f32 %v3264_v10, %v1541_v11 }
0x1e05   :  { %1561 = vrot.lane.b32.xlu1 %v3825_v21, %s3443_s2 }
0x1e77   :  { %v1562_v22 = vpop.permute.xlu1 %1561 }
0x1e78   :  { %2932 = vmatmul.mubr.msk.f32.vlgmr.msra.gmra.mrb[12].mxu0 %vm235_vm2, %v1562_v22 }
0x1e79   :  { %3114 = vmatpush3.bf16.msra.mxu0 %v3749_v9  ;;  %2953 = vmatprep.mubr.msk.f32.mxu0 %vm3439_vm0, %v3440_v2 }
0x1e7a   :  { %3115 = vmatprep.subr.bf16.mxu0 %v3438_v1 }
0x1e7d   :  { %3117 = vmatpush3.bf16.msra.mxu0 %v3767_v19 }
0x1e7e   :  { %3124 = vmatprep.subr.bf16.mxu0 %v3438_v1 }
0x1f4b   :  { %v1631_v23 = vpop.f32.mrb[12].mxu0 }
0x1f4c   :  { %v1635_v24 = vadd.f32 %v1631_v23, %v3789_v33  ;;  %v2933_v25 = vpop.f32.mrb[13].mxu0 }
0x1f4e   :  { %3267 = vtanh.f32 %v1635_v24  ;;  %v2649_v27 = vmul.f32 -1.442695, %v1635_v24 }
0x1f50   :  { %3269 = vpow2.f32 %v2649_v27 }
0x1f58   :  { %v3268_v26 = vpop.eup %3267 }
0x1f59   :  { %1645 = vrot.lane.b32.xlu0 %v3268_v26, %s3442_s5 }
0x1f5a   :  { %v3270_v28 = vpop.eup %3269 }
0x1f5b   :  { %v1639_v29 = vadd.f32 1.0, %v3270_v28 }
0x1f5d   :  { %3271 = vrcp.f32 %v1639_v29 }
0x1f67   :  { %v3272_v30 = vpop.eup %3271 }
0x1f68   :  { %v1643_v34 = vmul.f32 %v3272_v30, %v1537_v18 }
0x1fcb   :  { %v1646_v31 = vpop.permute.xlu0 %1645 }
0x1fcc   :  { %v1648_v32 = vmul.f32 %v3272_v30, %v1646_v31 }
0x1fce   :  { %1650 = vrot.lane.b32.xlu1 %v1648_v32, %s3443_s2 }
0x2040   :  { %v1651_v35 = vpop.permute.xlu1 %1650 }
0x2041   :  { %v1653_v36 = vadd.f32 %v1651_v35, %v1643_v34 }
0x2043   :  { %3273 = vtanh.f32 %v1653_v36 }
0x204d   :  { %v3274_v37 = vpop.eup %3273 }
0x204e   :  { %1656 = vrot.lane.b32.xlu0 %v3274_v37, %s3442_s5 }
0x20c0   :  { %v1657_v38 = vpop.permute.xlu0 %1656 }
0x20c1   :  { %v3840_v39 = vmul.f32 %v3272_v30, %v1657_v38 }
0x20c3   :  { %1677 = vrot.lane.b32.xlu1 %v3840_v39, %s3443_s2 }
0x2135   :  { %v1678_v40 = vpop.permute.xlu1 %1677 }
0x2136   :  { %2943 = vmatmul.mubr.msk.f32.vlgmr.msra.gmra.mrb[16].mxu1 %vm235_vm2, %v1678_v40 }
0x2137   :  { %3120 = vmatpush3.bf16.msra.mxu1 %v3749_v9  ;;  %2964 = vmatprep.mubr.msk.f32.mxu1 %vm3439_vm0, %v3440_v2 }
0x2138   :  { %3121 = vmatprep.subr.bf16.mxu1 %v3438_v1 }
0x213b   :  { %3123 = vmatpush3.bf16.msra.mxu1 %v3767_v19 }
0x213c   :  { %3130 = vmatprep.subr.bf16.mxu1 %v3438_v1 }
0x2209   :  { %v1747_v41 = vpop.f32.mrb[16].mxu1 }
0x220a   :  { %v1751_v42 = vadd.f32 %v1747_v41, %v3789_v33  ;;  %v2944_v43 = vpop.f32.mrb[17].mxu1 }
0x220c   :  { %3275 = vtanh.f32 %v1751_v42  ;;  %v2651_v45 = vmul.f32 -1.442695, %v1751_v42 }
0x220e   :  { %3277 = vpow2.f32 %v2651_v45 }
0x2216   :  { %v3276_v44 = vpop.eup %3275 }
0x2217   :  { %1761 = vrot.lane.b32.xlu0 %v3276_v44, %s3442_s5 }
0x2218   :  { %v3278_v46 = vpop.eup %3277 }
0x2219   :  { %v1755_v48 = vadd.f32 1.0, %v3278_v46 }
0x221b   :  { %3279 = vrcp.f32 %v1755_v48 }
0x2225   :  { %v3280_v49 = vpop.eup %3279 }
0x2226   :  { %v1759_v52 = vmul.f32 %v3280_v49, %v1653_v36 }
0x2289   :  { %v1762_v50 = vpop.permute.xlu0 %1761 }
0x228a   :  { %v1764_v51 = vmul.f32 %v3280_v49, %v1762_v50 }
0x228c   :  { %1766 = vrot.lane.b32.xlu1 %v1764_v51, %s3443_s2 }
0x22fe   :  { %v1767_v53 = vpop.permute.xlu1 %1766 }
0x22ff   :  { %v1769_v54 = vadd.f32 %v1767_v53, %v1759_v52 }
0x2301   :  { %3281 = vtanh.f32 %v1769_v54 }
0x230b   :  { %v3282_v55 = vpop.eup %3281 }
0x230c   :  { %1772 = vrot.lane.b32.xlu0 %v3282_v55, %s3442_s5 }
0x237e   :  { %v1773_v56 = vpop.permute.xlu0 %1772 }
0x237f   :  { %v3855_v57 = vmul.f32 %v3280_v49, %v1773_v56 }
0x2381   :  { %1793 = vrot.lane.b32.xlu1 %v3855_v57, %s3443_s2 }
0x23f3   :  { %v1794_v58 = vpop.permute.xlu1 %1793 }
0x23f4   :  { %2954 = vmatmul.mubr.msk.f32.vlgmr.msra.gmra.mrb[14].mxu0 %vm235_vm2, %v1794_v58 }
0x23f5   :  { %3126 = vmatpush3.bf16.msra.mxu0 %v3749_v9  ;;  %2975 = vmatprep.mubr.msk.f32.mxu0 %vm3439_vm0, %v3440_v2 }
0x23f6   :  { %3127 = vmatprep.subr.bf16.mxu0 %v3438_v1 }
0x23f9   :  { %3129 = vmatpush3.bf16.msra.mxu0 %v3767_v19 }
0x23fa   :  { %3136 = vmatprep.subr.bf16.mxu0 %v3438_v1 }
0x24c7   :  { %v1863_v59 = vpop.f32.mrb[14].mxu0 }
0x24c8   :  { %v1867_v60 = vadd.f32 %v1863_v59, %v3789_v33  ;;  %v2955_v61 = vpop.f32.mrb[15].mxu0 }
0x24ca   :  { %3283 = vtanh.f32 %v1867_v60  ;;  %v2653_v63 = vmul.f32 -1.442695, %v1867_v60 }
0x24cc   :  { %3285 = vpow2.f32 %v2653_v63 }
0x24d4   :  { %v3284_v62 = vpop.eup %3283 }
0x24d5   :  { %1877 = vrot.lane.b32.xlu0 %v3284_v62, %s3442_s5 }
0x24d6   :  { %v3286_v0 = vpop.eup %3285 }
0x24d7   :  { %v1871_v20 = vadd.f32 1.0, %v3286_v0 }
0x24d9   :  { %3287 = vrcp.f32 %v1871_v20 }
0x24e3   :  { %v3288_v3 = vpop.eup %3287 }
0x24e4   :  { %v1875_v6 = vmul.f32 %v3288_v3, %v1769_v54 }
0x2547   :  { %v1878_v4 = vpop.permute.xlu0 %1877 }
0x2548   :  { %v1880_v5 = vmul.f32 %v3288_v3, %v1878_v4 }
0x254a   :  { %1882 = vrot.lane.b32.xlu1 %v1880_v5, %s3443_s2 }
0x25bc   :  { %v1883_v7 = vpop.permute.xlu1 %1882 }
0x25bd   :  { %v1885_v8 = vadd.f32 %v1883_v7, %v1875_v6 }
0x25bf   :  { %3289 = vtanh.f32 %v1885_v8 }
0x25c9   :  { %v3290_v10 = vpop.eup %3289 }
0x25ca   :  { %1888 = vrot.lane.b32.xlu0 %v3290_v10, %s3442_s5 }
0x263c   :  { %v1889_v12 = vpop.permute.xlu0 %1888 }
0x263d   :  { %v3870_v13 = vmul.f32 %v3288_v3, %v1889_v12 }
0x263f   :  { %1909 = vrot.lane.b32.xlu1 %v3870_v13, %s3443_s2 }
0x26b1   :  { %v1910_v15 = vpop.permute.xlu1 %1909 }
0x26b2   :  { %2965 = vmatmul.mubr.msk.f32.vlgmr.msra.gmra.mrb[18].mxu1 %vm235_vm2, %v1910_v15 }
0x26b3   :  { %3132 = vmatpush3.bf16.msra.mxu1 %v3749_v9  ;;  %2986 = vmatprep.mubr.msk.f32.mxu1 %vm3439_vm0, %v3440_v2 }
0x26b4   :  { %3133 = vmatprep.subr.bf16.mxu1 %v3438_v1 }
0x26b7   :  { %3135 = vmatpush3.bf16.msra.mxu1 %v3767_v19 }
0x26b8   :  { %3142 = vmatprep.subr.bf16.mxu1 %v3438_v1 }
0x2785   :  { %v1979_v16 = vpop.f32.mrb[18].mxu1 }
0x2786   :  { %v1983_v18 = vadd.f32 %v1979_v16, %v3789_v33  ;;  %v2966_v14 = vpop.f32.mrb[19].mxu1 }
0x2788   :  { %3291 = vtanh.f32 %v1983_v18  ;;  %v2655_v22 = vmul.f32 -1.442695, %v1983_v18 }
0x278a   :  { %3293 = vpow2.f32 %v2655_v22 }
0x2792   :  { %v3292_v11 = vpop.eup %3291 }
0x2793   :  { %1993 = vrot.lane.b32.xlu0 %v3292_v11, %s3442_s5 }
0x2794   :  { %v3294_v23 = vpop.eup %3293 }
0x2795   :  { %v1987_v24 = vadd.f32 1.0, %v3294_v23 }
0x2797   :  { %3295 = vrcp.f32 %v1987_v24 }
0x27a1   :  { %v3296_v25 = vpop.eup %3295 }
0x27a2   :  { %v1991_v28 = vmul.f32 %v3296_v25, %v1885_v8 }
0x2805   :  { %v1994_v26 = vpop.permute.xlu0 %1993 }
0x2806   :  { %v1996_v27 = vmul.f32 %v3296_v25, %v1994_v26 }
0x2808   :  { %1998 = vrot.lane.b32.xlu1 %v1996_v27, %s3443_s2 }
0x287a   :  { %v1999_v29 = vpop.permute.xlu1 %1998 }
0x287b   :  { %v2001_v30 = vadd.f32 %v1999_v29, %v1991_v28 }
0x287d   :  { %3297 = vtanh.f32 %v2001_v30 }
0x2887   :  { %v3298_v31 = vpop.eup %3297 }
0x2888   :  { %2004 = vrot.lane.b32.xlu0 %v3298_v31, %s3442_s5 }
0x28fa   :  { %v2005_v32 = vpop.permute.xlu0 %2004 }
0x28fb   :  { %v3885_v34 = vmul.f32 %v3296_v25, %v2005_v32 }
0x28fd   :  { %2025 = vrot.lane.b32.xlu1 %v3885_v34, %s3443_s2 }
0x296f   :  { %v2026_v35 = vpop.permute.xlu1 %2025 }
0x2970   :  { %2976 = vmatmul.mubr.msk.f32.vlgmr.msra.gmra.mrb[16].mxu0 %vm235_vm2, %v2026_v35 }
0x2971   :  { %3138 = vmatpush3.bf16.msra.mxu0 %v3749_v9  ;;  %2997 = vmatprep.mubr.msk.f32.mxu0 %vm3439_vm0, %v3440_v2 }
0x2972   :  { %3139 = vmatprep.subr.bf16.mxu0 %v3438_v1 }
0x2975   :  { %3141 = vmatpush3.bf16.msra.mxu0 %v3767_v19 }
0x2976   :  { %3148 = vmatprep.subr.bf16.mxu0 %v3438_v1 }
0x2a43   :  { %v2095_v36 = vpop.f32.mrb[16].mxu0 }
0x2a44   :  { %v2099_v37 = vadd.f32 %v2095_v36, %v3789_v33  ;;  %v2977_v38 = vpop.f32.mrb[17].mxu0 }
0x2a46   :  { %3299 = vtanh.f32 %v2099_v37  ;;  %v2657_v41 = vmul.f32 -1.442695, %v2099_v37 }
0x2a48   :  { %3301 = vpow2.f32 %v2657_v41 }
0x2a50   :  { %v3300_v40 = vpop.eup %3299 }
0x2a51   :  { %2109 = vrot.lane.b32.xlu0 %v3300_v40, %s3442_s5 }
0x2a52   :  { %v3302_v42 = vpop.eup %3301 }
0x2a53   :  { %v2103_v43 = vadd.f32 1.0, %v3302_v42 }
0x2a55   :  { %3303 = vrcp.f32 %v2103_v43 }
0x2a5f   :  { %v3304_v44 = vpop.eup %3303 }
0x2a60   :  { %v2107_v48 = vmul.f32 %v3304_v44, %v2001_v30 }
0x2ac3   :  { %v2110_v45 = vpop.permute.xlu0 %2109 }
0x2ac4   :  { %v2112_v46 = vmul.f32 %v3304_v44, %v2110_v45 }
0x2ac6   :  { %2114 = vrot.lane.b32.xlu1 %v2112_v46, %s3443_s2 }
0x2b38   :  { %v2115_v49 = vpop.permute.xlu1 %2114 }
0x2b39   :  { %v2117_v50 = vadd.f32 %v2115_v49, %v2107_v48  ;;  %v2642_v49 = vld [vmem:[%s4035_s10] ss:$0 sm:$0xff]  ;;  %s3445_s10 = smov 1  }
0x2b3b   :  { %3305 = vtanh.f32 %v2117_v50 }
0x2b45   :  { %v3306_v51 = vpop.eup %3305 }
0x2b46   :  { %2120 = vrot.lane.b32.xlu0 %v3306_v51, %s3442_s5 }
0x2bb8   :  { %v2121_v52 = vpop.permute.xlu0 %2120 }
0x2bb9   :  { %v3900_v53 = vmul.f32 %v3304_v44, %v2121_v52 }
0x2bbb   :  { %2141 = vrot.lane.b32.xlu1 %v3900_v53, %s3443_s2 }
0x2c2d   :  { %v2142_v54 = vpop.permute.xlu1 %2141 }
0x2c2e   :  { %2987 = vmatmul.mubr.msk.f32.vlgmr.msra.gmra.mrb[20].mxu1 %vm235_vm2, %v2142_v54 }
0x2c2f   :  { %3144 = vmatpush3.bf16.msra.mxu1 %v3749_v9  ;;  %3008 = vmatprep.mubr.msk.f32.mxu1 %vm3439_vm0, %v3440_v2 }
0x2c30   :  { %3145 = vmatprep.subr.bf16.mxu1 %v3438_v1 }
0x2c33   :  { %3147 = vmatpush3.bf16.msra.mxu1 %v3767_v19 }
0x2d01   :  { %v2211_v55 = vpop.f32.mrb[20].mxu1 }
0x2d02   :  { %v2215_v56 = vadd.f32 %v2211_v55, %v3789_v33  ;;  %v2988_v58 = vpop.f32.mrb[21].mxu1 }
0x2d03   :  { %v1302_v58 = vmax.f32 %v3795_v47, 0.0 }
0x2d04   :  { %3307 = vtanh.f32 %v2215_v56  ;;  %v2659_v60 = vmul.f32 -1.442695, %v2215_v56 }
0x2d06   :  { %3309 = vpow2.f32 %v2659_v60  ;;  %v1428_v60 = vmax.f32 %v3810_v17, 0.0 }
0x2d0e   :  { %v3308_v59 = vpop.eup %3307 }
0x2d0f   :  { %2225 = vrot.lane.b32.xlu0 %v3308_v59, %s3442_s5 }
0x2d10   :  { %v3310_v61 = vpop.eup %3309 }
0x2d11   :  { %v2219_v62 = vadd.f32 1.0, %v3310_v61 }
0x2d13   :  { %3311 = vrcp.f32 %v2219_v62 }
0x2d1d   :  { %v3312_v63 = vpop.eup %3311 }
0x2d1e   :  { %v2223_v3 = vmul.f32 %v3312_v63, %v2117_v50 }
0x2d81   :  { %v2226_v0 = vpop.permute.xlu0 %2225 }
0x2d82   :  { %v2228_v20 = vmul.f32 %v3312_v63, %v2226_v0 }
0x2d84   :  { %2230 = vrot.lane.b32.xlu1 %v2228_v20, %s3443_s2 }
0x2df6   :  { %v2231_v4 = vpop.permute.xlu1 %2230 }
0x2df7   :  { %v2233_v5 = vadd.f32 %v2231_v4, %v2223_v3 }
0x2df9   :  { %3313 = vtanh.f32 %v2233_v5 }
0x2e03   :  { %v3314_v6 = vpop.eup %3313 }
0x2e04   :  { %2236 = vrot.lane.b32.xlu0 %v3314_v6, %s3442_s5  ;;  %v1544_v6 = vmax.f32 %v3825_v21, 0.0 }
0x2e76   :  { %v2237_v7 = vpop.permute.xlu0 %2236 }
0x2e77   :  { %v3914_v8 = vmul.f32 %v3312_v63, %v2237_v7 }
0x2e79   :  { %2257 = vrot.lane.b32.xlu1 %v3914_v8, %s3443_s2 }
0x2eeb   :  { %v2258_v10 = vpop.permute.xlu1 %2257 }
0x2eec   :  { %2998 = vmatmul.mubr.msk.f32.vlgmr.msra.gmra.mrb[18].mxu0 %vm235_vm2, %v2258_v10  ;;  %v3961_v10 = vld [vmem:[#allocation2] ss:$0 sm:$0xff] }
0x2eed   :  { %3150 = vmatpush3.bf16.msra.mxu0 %v3749_v9  ;;  %3019 = vmatprep.mubr.msk.f32.mxu0 %vm3439_vm0, %v3440_v2 }
0x2eee   :  { %3151 = vmatprep.subr.bf16.mxu0 %v3438_v1 }
0x2ef1   :  { %3153 = vmatpush3.bf16.msra.mxu0 %v3767_v19 }
0x2fbf   :  { %v2327_v12 = vpop.f32.mrb[18].mxu0 }
0x2fc0   :  { %v2331_v15 = vadd.f32 %v2327_v12, %v3789_v33  ;;  %v2999_v16 = vpop.f32.mrb[19].mxu0 }
0x2fc2   :  { %3315 = vtanh.f32 %v2331_v15  ;;  %v2661_v14 = vmul.f32 -1.442695, %v2331_v15 }
0x2fc4   :  { %3317 = vpow2.f32 %v2661_v14 }
0x2fcc   :  { %v3316_v18 = vpop.eup %3315 }
0x2fcd   :  { %2341 = vrot.lane.b32.xlu0 %v3316_v18, %s3442_s5 }
0x2fce   :  { %v3318_v11 = vpop.eup %3317 }
0x2fcf   :  { %v2335_v22 = vadd.f32 1.0, %v3318_v11 }
0x2fd1   :  { %3319 = vrcp.f32 %v2335_v22 }
0x2fdb   :  { %v3320_v9 = vpop.eup %3319 }
0x2fdc   :  { %v2339_v1 = vmul.f32 %v3320_v9, %v2233_v5 }
0x303f   :  { %v2342_v23 = vpop.permute.xlu0 %2341 }
0x3040   :  { %v2344_v2 = vmul.f32 %v3320_v9, %v2342_v23  ;;  %v1776_v23 = vmax.f32 %v3855_v57, 0.0 }
0x3042   :  { %2346 = vrot.lane.b32.xlu1 %v2344_v2, %s3443_s2 }
0x30b4   :  { %v2347_v19 = vpop.permute.xlu1 %2346 }
0x30b5   :  { %v2349_v24 = vadd.f32 %v2347_v19, %v2339_v1 }
0x30b7   :  { %3321 = vtanh.f32 %v2349_v24 }
0x30c1   :  { %v3322_v25 = vpop.eup %3321 }
0x30c2   :  { %2352 = vrot.lane.b32.xlu0 %v3322_v25, %s3442_s5 }
0x3134   :  { %v2353_v26 = vpop.permute.xlu0 %2352 }
0x3135   :  { %v3928_v27 = vmul.f32 %v3320_v9, %v2353_v26  ;;  %v1660_v26 = vmax.f32 %v3840_v39, 0.0 }
0x3137   :  { %2373 = vrot.lane.b32.xlu1 %v3928_v27, %s3443_s2 }
0x31a9   :  { %v2374_v28 = vpop.permute.xlu1 %2373 }
0x31aa   :  { %3009 = vmatmul.mubr.msk.f32.vlgmr.msra.gmra.mrb[22].mxu1 %vm235_vm2, %v2374_v28 }
0x327d   :  { %v2443_v29 = vpop.f32.mrb[22].mxu1 }
0x327e   :  { %v2447_v30 = vadd.f32 %v2443_v29, %v3789_v33  ;;  %v3010_v31 = vpop.f32.mrb[23].mxu1 }
0x3280   :  { %3323 = vtanh.f32 %v2447_v30  ;;  %v2663_v35 = vmul.f32 -1.442695, %v2447_v30  ;;  %v2008_v30 = vmax.f32 %v3885_v34, 0.0 }
0x3282   :  { %3325 = vpow2.f32 %v2663_v35 }
0x328a   :  { %v3324_v32 = vpop.eup %3323 }
0x328b   :  { %2457 = vrot.lane.b32.xlu0 %v3324_v32, %s3442_s5  ;;  %v2124_v32 = vmax.f32 %v3900_v53, 0.0 }
0x328c   :  { %v3326_v36 = vpop.eup %3325 }
0x328d   :  { %v2451_v37 = vadd.f32 1.0, %v3326_v36  ;;  %v2356_v36 = vmax.f32 %v3928_v27, 0.0 }
0x328f   :  { %3327 = vrcp.f32 %v2451_v37 }
0x3299   :  { %v3328_v38 = vpop.eup %3327 }
0x329a   :  { %v2455_v42 = vmul.f32 %v3328_v38, %v2349_v24 }
0x32fd   :  { %v2458_v40 = vpop.permute.xlu0 %2457 }
0x32fe   :  { %v2460_v41 = vmul.f32 %v3328_v38, %v2458_v40 }
0x3300   :  { %2462 = vrot.lane.b32.xlu1 %v2460_v41, %s3443_s2 }
0x3372   :  { %v2463_v43 = vpop.permute.xlu1 %2462 }
0x3373   :  { %v2465_v44 = vadd.f32 %v2463_v43, %v2455_v42 }
0x3375   :  { %3329 = vtanh.f32 %v2465_v44 }
0x337f   :  { %v3330_v45 = vpop.eup %3329 }
0x3380   :  { %2468 = vrot.lane.b32.xlu0 %v3330_v45, %s3442_s5 }
0x33f2   :  { %v2469_v46 = vpop.permute.xlu0 %2468 }
0x33f3   :  { %v3937_v48 = vmul.f32 %v3328_v38, %v2469_v46 }
0x33f5   :  { %2489 = vrot.lane.b32.xlu1 %v3937_v48, %s3443_s2  ;;  %v2472_v40 = vmax.f32 %v3937_v48, 0.0 }
0x33f9   :  { %1308 = vrot.lane.b32.xlu1 %v2642_v49, %s3444_s7  ;;  %v1892_v49 = vmax.f32 %v3870_v13, 0.0 }
0x3467   :  { %v2490_v50 = vpop.permute.xlu1 %2489 }
0x3468   :  { %3020 = vmatmul.mubr.msk.f32.vlgmr.msra.gmra.mrb[20].mxu0 %vm235_vm2, %v2490_v50 }
0x346b   :  { %v3946_v56 = vpop.permute.xlu1 %1308 }
0x346c   :  { %v1311_v59 = vmul.f32 %v3946_v56, %v1302_v58  ;;  %v1429_v61 = vmul.f32 %v1428_v60, %v3946_v56  ;;  %v1545_v7 = vmul.f32 %v1544_v6, %v3946_v56  ;;  %v1777_v2 = vmul.f32 %v1776_v23, %v3946_v56 }
0x346d   :  { %v1661_v29 = vmul.f32 %v1660_v26, %v3946_v56  ;;  %v2009_v31 = vmul.f32 %v2008_v30, %v3946_v56  ;;  %v2125_v39 = vmul.f32 %v2124_v32, %v3946_v56  ;;  %v2357_v38 = vmul.f32 %v2356_v36, %v3946_v56 }
0x346e   :  { %v2473_v41 = vmul.f32 %v2472_v40, %v3946_v56  ;;  %v1893_v50 = vmul.f32 %v1892_v49, %v3946_v56  ;;  %v2240_v58 = vmax.f32 %v3914_v8, 0.0 }
0x3470   :  { %v2241_v13 = vmul.f32 %v2240_v58, %v3946_v56 }
0x353b   :  { %v2559_v51 = vpop.f32.mrb[20].mxu0 }
0x353c   :  { %v2563_v52 = vadd.f32 %v2559_v51, %v3789_v33  ;;  %v3021_v54 = vpop.f32.mrb[21].mxu0 }
0x353e   :  { %3331 = vtanh.f32 %v2563_v52  ;;  %v2665_v33 = vmul.f32 -1.442695, %v2563_v52 }
0x3540   :  { %3333 = vpow2.f32 %v2665_v33 }
0x3548   :  { %v3332_v55 = vpop.eup %3331 }
0x3549   :  { %2573 = vrot.lane.b32.xlu0 %v3332_v55, %s3442_s5 }
0x354a   :  { %v3334_v62 = vpop.eup %3333 }
0x354b   :  { %v2567_v63 = vadd.f32 1.0, %v3334_v62 }
0x354d   :  { %1313 = vrot.lane.b32.xlu0 %v1311_v59, %s3443_s2  ;;  %3335 = vrcp.f32 %v2567_v63 }
0x3551   :  { %1431 = vrot.lane.b32.xlu0 %v1429_v61, %s3443_s2 }
0x3557   :  { %v3336_v0 = vpop.eup %3335 }
0x3558   :  { %v2571_v22 = vmul.f32 %v3336_v0, %v2465_v44 }
0x35bb   :  { %v2574_v20 = vpop.permute.xlu0 %2573 }
0x35bc   :  { %v2576_v47 = vmul.f32 %v3336_v0, %v2574_v20 }
0x35be   :  { %2578 = vrot.lane.b32.xlu0 %v2576_v47, %s3443_s2 }
0x35bf   :  { %v1314_v3 = vpop.permute.xlu0 %1313 }
0x35c0   :  { %v1316_v4 = vsel %vm235_vm2, %v1314_v3, 0.0 }
0x35c1   :  { %1317 = vadd.xlane.f32.xlu1 %v1316_v4 }
0x35c3   :  { %v1432_v17 = vpop.permute.xlu0 %1431 }
0x35c4   :  { %v1434_v5 = vsel %vm235_vm2, %v1432_v17, 0.0 }
0x35dd   :  { %1435 = vadd.xlane.f32.xlu0 %v1434_v5 }
0x35f3   :  { %1547 = vrot.lane.b32.xlu0 %v1545_v7, %s3443_s2 }
0x3630   :  { %v2579_v16 = vpop.permute.xlu0 %2578 }
0x3631   :  { %v2581_v9 = vadd.f32 %v2579_v16, %v2571_v22 }
0x3633   :  { %3337 = vtanh.f32 %v2581_v9 }
0x363d   :  { %v3338_v1 = vpop.eup %3337 }
0x364e   :  { %v1318_v12 = vpop.xlane.xlu1 %1317 }
0x364f   :  { %v1325_v15 = vadd.f32 %v3961_v10, %v1318_v12 }
0x3651   :  { %1327 = vst.msk [vmem:[#allocation9] sm:$0xff] %vm1326_vm3, %v1325_v15 }
0x366a   :  { %v1436_v18 = vpop.xlane.xlu0 %1435 }
0x366b   :  { %v1437_v14 = vadd.f32 %v3961_v10, %v1436_v18 }
0x366d   :  { %1439 = vrot.lane.b32.xlu1 %v1437_v14, %s3445_s10 }
0x366e   :  { %v1548_v11 = vpop.permute.xlu0 %1547 }
0x366f   :  { %v1550_v21 = vsel %vm235_vm2, %v1548_v11, 0.0 }
0x3691   :  { %1551 = vadd.xlane.f32.xlu1 %v1550_v21 }
0x36a2   :  { %1779 = vrot.lane.b32.xlu1 %v1777_v2, %s3443_s2 }
0x36a6   :  { %2584 = vrot.lane.b32.xlu1 %v3338_v1, %s3442_s5  ;;  %s3447_s5 = smov 3  }
0x36df   :  { %v1440_v19 = vpop.permute.xlu1 %1439 }
0x36e0   :  { %1443 = vst.msk [vmem:[#allocation9] sm:$0xff] %vm1442_vm4, %v1440_v19 }
0x371e   :  { %v1552_v24 = vpop.xlane.xlu1 %1551 }
0x371f   :  { %v1553_v25 = vadd.f32 %v3961_v10, %v1552_v24 }
0x3721   :  { %1555 = vrot.lane.b32.xlu0 %v1553_v25, %s3446_s14 }
0x3722   :  { %v1780_v28 = vpop.permute.xlu1 %1779 }
0x3723   :  { %v1782_v57 = vsel %vm235_vm2, %v1780_v28, 0.0 }
0x3724   :  { %1783 = vadd.xlane.f32.xlu1 %v1782_v57 }
0x3725   :  { %1663 = vrot.lane.b32.xlu0 %v1661_v29, %s3443_s2 }
0x3726   :  { %v2585_v35 = vpop.permute.xlu1 %2584 }
0x3727   :  { %v2587_v37 = vmul.f32 %v3336_v0, %v2585_v35 }
0x3729   :  { %v2588_v34 = vmax.f32 %v2587_v37, 0.0 }
0x372b   :  { %v2589_v53 = vmul.f32 %v2588_v34, %v3946_v56 }
0x3735   :  { %2011 = vrot.lane.b32.xlu1 %v2009_v31, %s3443_s2 }
0x3739   :  { %2127 = vrot.lane.b32.xlu1 %v2125_v39, %s3443_s2 }
0x373d   :  { %2359 = vrot.lane.b32.xlu1 %v2357_v38, %s3443_s2 }
0x3741   :  { %2475 = vrot.lane.b32.xlu1 %v2473_v41, %s3443_s2 }
0x3745   :  { %2591 = vrot.lane.b32.xlu1 %v2589_v53, %s3443_s2 }
0x3793   :  { %v1556_v27 = vpop.permute.xlu0 %1555 }
0x3794   :  { %1559 = vst.msk [vmem:[#allocation9] sm:$0xff] %vm1558_vm5, %v1556_v27 }
0x3797   :  { %v1664_v42 = vpop.permute.xlu0 %1663 }
0x3798   :  { %v1666_v43 = vsel %vm235_vm2, %v1664_v42, 0.0 }
0x3799   :  { %1667 = vadd.xlane.f32.xlu0 %v1666_v43 }
0x37b1   :  { %v1784_v46 = vpop.xlane.xlu1 %1783 }
0x37b2   :  { %v1785_v48 = vadd.f32 %v3961_v10, %v1784_v46 }
0x37b5   :  { %v2012_v61 = vpop.permute.xlu1 %2011 }
0x37b6   :  { %v2014_v63 = vsel %vm235_vm2, %v2012_v61, 0.0 }
0x37b9   :  { %v2128_v33 = vpop.permute.xlu1 %2127 }
0x37ba   :  { %v2130_v5 = vsel %vm235_vm2, %v2128_v33, 0.0 }
0x37bd   :  { %v2360_v62 = vpop.permute.xlu1 %2359 }
0x37be   :  { %v2362_v6 = vsel %vm235_vm2, %v2360_v62, 0.0 }
0x37c1   :  { %v2476_v47 = vpop.permute.xlu1 %2475 }
0x37c2   :  { %v2478_v8 = vsel %vm235_vm2, %v2476_v47, 0.0 }
0x37c5   :  { %v2592_v56 = vpop.permute.xlu1 %2591 }
0x37c6   :  { %v2594_v7 = vsel %vm235_vm2, %v2592_v56, 0.0 }
0x3826   :  { %v1668_v44 = vpop.xlane.xlu0 %1667 }
0x3827   :  { %v1669_v45 = vadd.f32 %v3961_v10, %v1668_v44 }
0x3829   :  { %1671 = vrot.lane.b32.xlu0 %v1669_v45, %s3447_s5 }
0x382d   :  { %1787 = vrot.lane.b32.xlu0 %v1785_v48, %s3448_s21 }
0x3831   :  { %1895 = vrot.lane.b32.xlu0 %v1893_v50, %s3443_s2 }
0x389b   :  { %v1672_v51 = vpop.permute.xlu0 %1671 }
0x389c   :  { %1675 = vst.msk [vmem:[#allocation9] sm:$0xff] %vm1674_vm6, %v1672_v51 }
0x389f   :  { %v1788_v52 = vpop.permute.xlu0 %1787 }
0x38a0   :  { %1791 = vst.msk [vmem:[#allocation9] sm:$0xff] %vm1790_vm7, %v1788_v52 }
0x38a3   :  { %v1896_v54 = vpop.permute.xlu0 %1895 }
0x38a4   :  { %v1898_v55 = vsel %vm235_vm2, %v1896_v54, 0.0 }
0x38a5   :  { %1899 = vadd.xlane.f32.xlu0 %v1898_v55 }
0x38bb   :  { %2243 = vrot.lane.b32.xlu0 %v2241_v13, %s3443_s2  ;;  %s3450_s2 = smov 6  }
0x3932   :  { %v1900_v59 = vpop.xlane.xlu0 %1899 }
0x3933   :  { %v1901_v60 = vadd.f32 %v3961_v10, %v1900_v59 }
0x3935   :  { %1903 = vrot.lane.b32.xlu1 %v1901_v60, %s3449_s25 }
0x3936   :  { %v2244_v0 = vpop.permute.xlu0 %2243 }
0x3937   :  { %v2246_v20 = vsel %vm235_vm2, %v2244_v0, 0.0 }
0x3959   :  { %2015 = vadd.xlane.f32.xlu1 %v2014_v63 }
0x395d   :  { %2247 = vadd.xlane.f32.xlu1 %v2246_v20 }
0x3961   :  { %2479 = vadd.xlane.f32.xlu1 %v2478_v8 }
0x39a7   :  { %v1904_v3 = vpop.permute.xlu1 %1903 }
0x39a8   :  { %1907 = vst.msk [vmem:[#allocation9] sm:$0xff] %vm1906_vm8, %v1904_v3 }
0x39e6   :  { %v2016_v4 = vpop.xlane.xlu1 %2015 }
0x39e7   :  { %v2017_v17 = vadd.f32 %v3961_v10, %v2016_v4 }
0x39e9   :  { %2019 = vrot.lane.b32.xlu0 %v2017_v17, %s3450_s2 }
0x39ea   :  { %v2248_v12 = vpop.xlane.xlu1 %2247 }
0x39eb   :  { %v2249_v15 = vadd.f32 %v3961_v10, %v2248_v12 }
0x39ee   :  { %v2480_v22 = vpop.xlane.xlu1 %2479 }
0x39ef   :  { %v2481_v23 = vadd.f32 %v3961_v10, %v2480_v22 }
0x3a08   :  { %2131 = vadd.xlane.f32.xlu0 %v2130_v5 }
0x3a0c   :  { %2363 = vadd.xlane.f32.xlu0 %v2362_v6 }
0x3a10   :  { %2595 = vadd.xlane.f32.xlu0 %v2594_v7 }
0x3a26   :  { %2251 = vrot.lane.b32.xlu0 %v2249_v15, %s3435_s15  ;;  %s3453_s15 = smov 11  }
0x3a5b   :  { %v2020_v16 = vpop.permute.xlu0 %2019 }
0x3a5c   :  { %2023 = vst.msk [vmem:[#allocation9] sm:$0xff] %vm2022_vm9, %v2020_v16 }
0x3a95   :  { %v2132_v18 = vpop.xlane.xlu0 %2131 }
0x3a96   :  { %v2133_v14 = vadd.f32 %v3961_v10, %v2132_v18 }
0x3a98   :  { %2135 = vrot.lane.b32.xlu1 %v2133_v14, %s3451_s26 }
0x3a99   :  { %v2364_v11 = vpop.xlane.xlu0 %2363 }
0x3a9a   :  { %v2365_v21 = vadd.f32 %v3961_v10, %v2364_v11 }
0x3a9c   :  { %2367 = vrot.lane.b32.xlu1 %v2365_v21, %s3452_s27 }
0x3a9d   :  { %v2596_v9 = vpop.xlane.xlu0 %2595 }
0x3a9e   :  { %v2597_v2 = vadd.f32 %v3961_v10, %v2596_v9 }
0x3aa0   :  { %2599 = vrot.lane.b32.xlu0 %v2597_v2, %s3453_s15  ;;  %2483 = vrot.lane.b32.xlu1 %v2481_v23, %s3454_s0 }
0x3aa1   :  { %v2252_v19 = vpop.permute.xlu0 %2251 }
0x3b0a   :  { %v2136_v1 = vpop.permute.xlu1 %2135 }
0x3b0b   :  { %2139 = vst.msk [vmem:[#allocation9] sm:$0xff] %vm2138_vm10, %v2136_v1 }
0x3b0c   :  { %2255 = vst.msk [vmem:[#allocation9] sm:$0xff] %vm2254_vm11, %v2252_v19 }
0x3b0e   :  { %v2368_v24 = vpop.permute.xlu1 %2367 }
0x3b0f   :  { %2371 = vst.msk [vmem:[#allocation9] sm:$0xff] %vm2370_vm12, %v2368_v24 }
0x3b12   :  { %v2600_v25 = vpop.permute.xlu0 %2599  ;;  %v2484_v26 = vpop.permute.xlu1 %2483 }
0x3b13   :  { %2487 = vst.msk [vmem:[#allocation9] sm:$0xff] %vm2486_vm13, %v2484_v26 }
0x3b14   :  { %2603 = vst.msk [vmem:[#allocation9] sm:$0xff] %vm2602_vm14, %v2600_v25 }
0x3b15   :  { %3416 = shalt.err (!%p3413_p0)
}
0x3b16   :  { %s3417_s30 = scalar_lea.hbm %s4037_s12, 128 }
0x3b17   :  { %p3418_p1 = scmp.ne.s32.totalorder %s4037_s12, %s3417_s30  ;;  %p3421_p2 = scmp.lt.u32.totalorder %s3417_s30, %s4037_s12 }
0x3b19   :  { %p3423_p3 = pnand %p3421_p2, %p3418_p1 }
0x3b1b   :  { %3426 = shalt.err (!%p3423_p3)
}
0x3b1c   :  { %2613 = dma.vmem_to_hbm [thread:$0]  %s2611_s29, 128, %s4037_s12, [#allocation5]  }
0x3b1d   :  { %3431 = dma.done.wait [#allocation5], 128  }
0x3b1e   :  { %3432 = vsyncadd [#allocation5], 4294967168 }
0x3b1f   :  { %2617 = vsyncpa [#allocation4], 1 }
0x3b20   :  { %2618 = vsyncpa [#allocation7], 1 }
0x3b21   :  { %2619 = vsyncpa [#allocation5], 1 }

</bundles_post_ra>
